<compile_context>
chip_gen: v5e
topology: v5e:2x2
jax: 0.10.0
libtpu: 0.0.40
codegen_flags: <defaults>
</compile_context>

<pallas_src>
import jax
import jax.numpy as jnp
from jax.experimental import pallas as pl
from jax.experimental.pallas import tpu as pltpu

HIDDEN = 32
VOCAB = 50
MARGIN = 1.0      # nn.TripletMarginLoss defaults
EPS = 1e-6

_VMEM = pl.BlockSpec(memory_space=pltpu.MemorySpace.VMEM)


# ----------------------------- Pallas kernel -----------------------------

def _make_encode_kernel(T, B_total, H, fuse_loss, B_per=None):
    """Build the fused encode (+ optional triplet-loss epilogue) kernel.

    Kernel refs:
      x_ref:   (T*B_total, 2H)  combined time-major input, row t*B_total + b is
                                [emb(x[b, t]) | emb(x[b, T-1-t])].
      wih_ref: (2H, 8H)  block-structured input->gate weights, columns ordered
                         [i_f, i_b, f_f, f_b, o_f, o_b, g_f, g_b].
      whh_ref: (2H, 8H)  block-structured hidden->gate weights, same order.
      b_ref:   (1, 8H)   fused b_ih + b_hh, same order.
      w1/b1, w2/b2:      projection MLP (weights pre-transposed to (in, out)).
      out_ref: (B_total, H) embeddings, or (1, 1) scalar loss if fuse_loss.
    """
    H2, H4, H6 = 2 * H, 4 * H, 6 * H

    def kernel(x_ref, wih_ref, whh_ref, b_ref, w1_ref, b1_ref, w2_ref, b2_ref,
               out_ref):
        # Hoisted input projection: ONE MXU op for all timesteps/gates/directions.
        wx = (jnp.dot(x_ref[...], wih_ref[...],
                      preferred_element_type=jnp.float32)
              + b_ref[...])                                    # (T*B_total, 8H)
        whh = whh_ref[...]                                     # (2H, 8H)

        h = jnp.zeros((B_total, H2), jnp.float32)              # [h_fwd | h_bwd]
        c = jnp.zeros((B_total, H2), jnp.float32)
        acc = jnp.zeros((B_total, H2), jnp.float32)

        # Fully unrolled recurrence (T small & static); fwd & bwd chains share
        # one carry / one recurrent matmul per step.
        for t in range(T):
            wx_t = wx[t * B_total:(t + 1) * B_total, :]        # static slice
            gates = wx_t + jnp.dot(h, whh,
                                   preferred_element_type=jnp.float32)
            sig = jax.nn.sigmoid(gates[:, :H6])                # [i | f | o]
            g = jnp.tanh(gates[:, H6:])                        # [g_f | g_b]
            c = sig[:, H2:H4] * c + sig[:, :H2] * g
            h = sig[:, H4:H6] * jnp.tanh(c)
            acc = acc + h

        pooled = acc * (1.0 / T)      # (B_total, 2H); mean(concat) == concat(means)

        h1 = jnp.maximum(
            jnp.dot(pooled, w1_ref[...],
                    preferred_element_type=jnp.float32) + b1_ref[...],
            0.0)
        # TODO(synk): training-mode Dropout(0.1) randomness not reproduced
        # (eval-mode identity).
        emb = (jnp.dot(h1, w2_ref[...],
                       preferred_element_type=jnp.float32) + b2_ref[...])

        if fuse_loss:
            e1 = emb[:B_per]
            e2 = emb[B_per:2 * B_per]
            e3 = emb[2 * B_per:]
            d_pos = jnp.sqrt(jnp.sum((e1 - e2 + EPS) ** 2, axis=-1,
                                     keepdims=True))
            d_neg = jnp.sqrt(jnp.sum((e1 - e3 + EPS) ** 2, axis=-1,
                                     keepdims=True))
            loss = jnp.maximum(d_pos - d_neg + MARGIN, 0.0)    # (B_per, 1)
            out_ref[...] = jnp.mean(loss).reshape(1, 1)
        else:
            out_ref[...] = emb.astype(out_ref.dtype)

    return kernel


def _call_encoder(params, x_comb, T, B_total, fuse_loss, B_per=None):
    kernel = _make_encode_kernel(T, B_total, HIDDEN, fuse_loss, B_per)
    if fuse_loss:
        out_shape = jax.ShapeDtypeStruct((1, 1), jnp.float32)
    else:
        out_shape = jax.ShapeDtypeStruct((B_total, HIDDEN), jnp.float32)
    return pl.pallas_call(
        kernel,
        out_shape=out_shape,
        in_specs=[_VMEM] * 8,
        out_specs=_VMEM,
    )(x_comb, params['wih_bd'], params['whh_bd'], params['b_fb'],
      params['w1'], params['b1'], params['w2'], params['b2'])


# ----------------------------- wrappers (jitted glue) -----------------------------

def _embed_combined(emb_table, ids):
    """(B, T) ids -> (T*B, 2H) combined fwd/bwd time-major embedded input."""
    B, T = ids.shape
    x = jnp.take(emb_table, ids, axis=0).astype(jnp.float32)   # (B, T, H) gather
    xf = jnp.transpose(x, (1, 0, 2))                           # (T, B, H)
    xb = xf[::-1]                                              # time-reversed
    xc = jnp.concatenate([xf, xb], axis=-1)                    # (T, B, 2H)
    return xc.reshape(T * B, 2 * HIDDEN)


@jax.jit
def _encode_jit(params, ids):
    B, T = ids.shape
    x_comb = _embed_combined(params['emb'], ids)
    return _call_encoder(params, x_comb, T, B, fuse_loss=False)


@jax.jit
def _triplet_jit(params, s1, s2, s3):
    B, T = s1.shape
    ids = jnp.concatenate([s1, s2, s3], axis=0)                # (3B, T)
    x_comb = _embed_combined(params['emb'], ids)
    loss = _call_encoder(params, x_comb, T, 3 * B, fuse_loss=True, B_per=B)
    return loss[0, 0]


def encode(params, ids):
    return _encode_jit(params, ids)


def forward(params, s1, s2=None, s3=None):
    if s2 is not None and s3 is not None:
        return _triplet_jit(params, s1, s2, s3)
    return _encode_jit(params, s1)


# ----------------------------- parameters -----------------------------

def init_raw_params(key, vocab=VOCAB, hidden=HIDDEN):
    """Raw torch-layout parameters (gate order i, f, g, o; Linear weights (out, in))."""
    H = hidden
    ks = jax.random.split(key, 13)
    bound = 1.0 / jnp.sqrt(jnp.float32(H))

    def uni(kk, shape):
        return jax.random.uniform(kk, shape, jnp.float32, -bound, bound)

    emb = 0.1 * jax.random.normal(ks[0], (vocab + 1, H), jnp.float32)
    emb = emb.at[0].set(0.0)                            # padding_idx=0

    return {
        'emb': emb,
        'wih_f': uni(ks[1], (4 * H, H)), 'whh_f': uni(ks[2], (4 * H, H)),
        'b_f': uni(ks[3], (4 * H,)) + uni(ks[4], (4 * H,)),   # b_ih + b_hh fused
        'wih_b': uni(ks[5], (4 * H, H)), 'whh_b': uni(ks[6], (4 * H, H)),
        'b_b': uni(ks[7], (4 * H,)) + uni(ks[8], (4 * H,)),
        'w1': uni(ks[9], (H, 2 * H)), 'b1': uni(ks[10], (H,)),
        'w2': uni(ks[11], (H, H)), 'b2': uni(ks[12], (H,)),
    }


def _split_gates(w, H):
    """torch gate order along the 4H axis: i, f, g, o."""
    return w[:H], w[H:2 * H], w[2 * H:3 * H], w[3 * H:]


def pack_params(raw, hidden=HIDDEN):
    """Repack raw torch-layout weights into the kernel's fused block layout."""
    H = hidden
    wi_f = _split_gates(raw['wih_f'], H)   # (i, f, g, o), each (H, H)
    wi_b = _split_gates(raw['wih_b'], H)
    wh_f = _split_gates(raw['whh_f'], H)
    wh_b = _split_gates(raw['whh_b'], H)
    bb_f = _split_gates(raw['b_f'], H)     # each (H,)
    bb_b = _split_gates(raw['b_b'], H)

    # Kernel column order (8 blocks of H): i_f, i_b, f_f, f_b, o_f, o_b, g_f, g_b
    # torch tuple indices: i=0, f=1, g=2, o=3.
    order = [(0, 'f'), (0, 'b'), (1, 'f'), (1, 'b'),
             (3, 'f'), (3, 'b'), (2, 'f'), (2, 'b')]

    Z = jnp.zeros((H, H), jnp.float32)

    def block_cols(w_f, w_b):
        cols = []
        for g, d in order:
            if d == 'f':
                cols.append(jnp.concatenate([w_f[g].T, Z], axis=0))  # fwd rows -> fwd cols
            else:
                cols.append(jnp.concatenate([Z, w_b[g].T], axis=0))  # bwd rows -> bwd cols
        return jnp.concatenate(cols, axis=1)                          # (2H, 8H)

    wih_bd = block_cols(wi_f, wi_b)
    whh_bd = block_cols(wh_f, wh_b)
    b_fb = jnp.concatenate(
        [(bb_f if d == 'f' else bb_b)[g] for g, d in order])[None, :]  # (1, 8H)

    return {
        'emb': raw['emb'],
        'wih_bd': wih_bd, 'whh_bd': whh_bd, 'b_fb': b_fb,
        'w1': raw['w1'].T, 'b1': raw['b1'][None, :],
        'w2': raw['w2'].T, 'b2': raw['b2'][None, :],
    }


# ----------------------------- pure-JAX reference -----------------------------

def reference_encode(raw, ids):
    H = HIDDEN
    x = jnp.take(raw['emb'], ids, axis=0).astype(jnp.float32)      # (B, T, H)
    B, T, _ = x.shape

    def lstm_dir(wih, whh, b, reverse):
        seq = x[:, ::-1, :] if reverse else x

        def scan_fn(carry, x_t):
            h, c = carry
            gates = x_t @ wih.T + h @ whh.T + b
            i = jax.nn.sigmoid(gates[:, :H])
            f = jax.nn.sigmoid(gates[:, H:2 * H])
            g = jnp.tanh(gates[:, 2 * H:3 * H])
            o = jax.nn.sigmoid(gates[:, 3 * H:])
            c = f * c + i * g
            h = o * jnp.tanh(c)
            return (h, c), h

        zeros = jnp.zeros((B, H), jnp.float32)
        _, hs = jax.lax.scan(scan_fn, (zeros, zeros), jnp.transpose(seq, (1, 0, 2)))
        return jnp.mean(hs, axis=0)

    mean_f = lstm_dir(raw['wih_f'], raw['whh_f'], raw['b_f'], False)
    mean_b = lstm_dir(raw['wih_b'], raw['whh_b'], raw['b_b'], True)
    pooled = jnp.concatenate([mean_f, mean_b], axis=-1)
    h1 = jnp.maximum(pooled @ raw['w1'].T + raw['b1'], 0.0)
    return h1 @ raw['w2'].T + raw['b2']


def reference_triplet(raw, s1, s2, s3):
    e1 = reference_encode(raw, s1)
    e2 = reference_encode(raw, s2)
    e3 = reference_encode(raw, s3)
    d_pos = jnp.sqrt(jnp.sum((e1 - e2 + EPS) ** 2, axis=-1))
    d_neg = jnp.sqrt(jnp.sum((e1 - e3 + EPS) ** 2, axis=-1))
    return jnp.mean(jnp.maximum(d_pos - d_neg + MARGIN, 0.0))


# ----------------------------- main -----------------------------

if __name__ == "__main__":
    key = jax.random.PRNGKey(0)
    pkey, k1, k2, k3 = jax.random.split(key, 4)
    raw = init_raw_params(pkey)
    params = pack_params(raw)

    B, T = 8, 8
    s1 = jax.random.randint(k1, (B, T), 0, VOCAB + 1, dtype=jnp.int32)
    s2 = jax.random.randint(k2, (B, T), 0, VOCAB + 1, dtype=jnp.int32)
    s3 = jax.random.randint(k3, (B, T), 0, VOCAB + 1, dtype=jnp.int32)

    emb1 = jax.block_until_ready(forward(params, s1))          # encode-only path
    loss = jax.block_until_ready(forward(params, s1, s2, s3))  # fused triplet path

    ref_emb = reference_encode(raw, s1)
    ref_loss = reference_triplet(raw, s1, s2, s3)

    assert emb1.shape == (B, HIDDEN)
    assert jnp.allclose(emb1, ref_emb, atol=1e-3, rtol=1e-3), "Pallas encode mismatch"
    assert loss.shape == () and jnp.isfinite(loss), "bad triplet loss"
    assert jnp.allclose(loss, ref_loss, atol=1e-3, rtol=1e-3), "Pallas triplet loss mismatch"

    print("KERNEL_OK")
</pallas_src>

<mosaic_0001>
module attributes {stable_mosaic.version = 11 : i64} {
  func.func @kernel(%arg0: memref<64x64xf32, #tpu.memory_space<vmem>>, %arg1: memref<64x256xf32, #tpu.memory_space<vmem>>, %arg2: memref<64x256xf32, #tpu.memory_space<vmem>>, %arg3: memref<1x256xf32, #tpu.memory_space<vmem>>, %arg4: memref<64x32xf32, #tpu.memory_space<vmem>>, %arg5: memref<1x32xf32, #tpu.memory_space<vmem>>, %arg6: memref<32x32xf32, #tpu.memory_space<vmem>>, %arg7: memref<1x32xf32, #tpu.memory_space<vmem>>, %arg8: memref<8x32xf32, #tpu.memory_space<vmem>>) attributes {dimension_semantics = [], scalar_prefetch = 0 : i64, scratch_operands = 0 : i64, tpu.core_type = #tpu.core_type<tc>} {
    %c0 = arith.constant 0 : index
    %c0_0 = arith.constant 0 : index
    %0 = vector.load %arg0[%c0, %c0_0] : memref<64x64xf32, #tpu.memory_space<vmem>>, vector<64x64xf32>
    %c0_1 = arith.constant 0 : index
    %c0_2 = arith.constant 0 : index
    %1 = vector.load %arg1[%c0_1, %c0_2] : memref<64x256xf32, #tpu.memory_space<vmem>>, vector<64x256xf32>
    %cst = arith.constant dense<0.000000e+00> : vector<64x256xf32>
    %2 = tpu.matmul %0, %1, %cst {dimension_numbers = #tpu.dot_dimension_numbers<[1], [0], [0], [1], [0, 0, 1, 1], [], []>} : vector<64x64xf32>, vector<64x256xf32>, vector<64x256xf32> -> vector<64x256xf32>
    %c0_3 = arith.constant 0 : index
    %c0_4 = arith.constant 0 : index
    %3 = vector.load %arg3[%c0_3, %c0_4] : memref<1x256xf32, #tpu.memory_space<vmem>>, vector<1x256xf32>
    %4 = vector.broadcast %3 : vector<1x256xf32> to vector<64x256xf32>
    %5 = arith.addf %2, %4 : vector<64x256xf32>
    %c0_5 = arith.constant 0 : index
    %c0_6 = arith.constant 0 : index
    %6 = vector.load %arg2[%c0_5, %c0_6] : memref<64x256xf32, #tpu.memory_space<vmem>>, vector<64x256xf32>
    %cst_7 = arith.constant 0.000000e+00 : f32
    %7 = vector.broadcast %cst_7 : f32 to vector<8x64xf32>
    %cst_8 = arith.constant 0.000000e+00 : f32
    %8 = vector.broadcast %cst_8 : f32 to vector<8x64xf32>
    %cst_9 = arith.constant 0.000000e+00 : f32
    %9 = vector.broadcast %cst_9 : f32 to vector<8x64xf32>
    %10 = vector.extract_strided_slice %5 {offsets = [0, 0], sizes = [8, 256], strides = [1, 1]} : vector<64x256xf32> to vector<8x256xf32>
    %cst_10 = arith.constant dense<0.000000e+00> : vector<8x256xf32>
    %11 = tpu.matmul %7, %6, %cst_10 {dimension_numbers = #tpu.dot_dimension_numbers<[1], [0], [0], [1], [0, 0, 1, 1], [], []>} : vector<8x64xf32>, vector<64x256xf32>, vector<8x256xf32> -> vector<8x256xf32>
    %12 = arith.addf %10, %11 : vector<8x256xf32>
    %13 = vector.extract_strided_slice %12 {offsets = [0, 0], sizes = [8, 192], strides = [1, 1]} : vector<8x256xf32> to vector<8x192xf32>
    %14 = arith.negf %13 : vector<8x192xf32>
    %15 = math.exp %14 : vector<8x192xf32>
    %cst_11 = arith.constant 1.000000e+00 : f32
    %16 = vector.broadcast %cst_11 : f32 to vector<8x192xf32>
    %17 = arith.addf %16, %15 : vector<8x192xf32>
    %18 = arith.divf %16, %17 : vector<8x192xf32>
    %19 = vector.extract_strided_slice %12 {offsets = [0, 192], sizes = [8, 64], strides = [1, 1]} : vector<8x256xf32> to vector<8x64xf32>
    %20 = math.tanh %19 : vector<8x64xf32>
    %21 = vector.extract_strided_slice %18 {offsets = [0, 64], sizes = [8, 64], strides = [1, 1]} : vector<8x192xf32> to vector<8x64xf32>
    %22 = arith.mulf %21, %8 : vector<8x64xf32>
    %23 = vector.extract_strided_slice %18 {offsets = [0, 0], sizes = [8, 64], strides = [1, 1]} : vector<8x192xf32> to vector<8x64xf32>
    %24 = arith.mulf %23, %20 : vector<8x64xf32>
    %25 = arith.addf %22, %24 : vector<8x64xf32>
    %26 = vector.extract_strided_slice %18 {offsets = [0, 128], sizes = [8, 64], strides = [1, 1]} : vector<8x192xf32> to vector<8x64xf32>
    %27 = math.tanh %25 : vector<8x64xf32>
    %28 = arith.mulf %26, %27 : vector<8x64xf32>
    %29 = arith.addf %9, %28 : vector<8x64xf32>
    %30 = vector.extract_strided_slice %5 {offsets = [8, 0], sizes = [8, 256], strides = [1, 1]} : vector<64x256xf32> to vector<8x256xf32>
    %cst_12 = arith.constant dense<0.000000e+00> : vector<8x256xf32>
    %31 = tpu.matmul %28, %6, %cst_12 {dimension_numbers = #tpu.dot_dimension_numbers<[1], [0], [0], [1], [0, 0, 1, 1], [], []>} : vector<8x64xf32>, vector<64x256xf32>, vector<8x256xf32> -> vector<8x256xf32>
    %32 = arith.addf %30, %31 : vector<8x256xf32>
    %33 = vector.extract_strided_slice %32 {offsets = [0, 0], sizes = [8, 192], strides = [1, 1]} : vector<8x256xf32> to vector<8x192xf32>
    %34 = arith.negf %33 : vector<8x192xf32>
    %35 = math.exp %34 : vector<8x192xf32>
    %cst_13 = arith.constant 1.000000e+00 : f32
    %36 = vector.broadcast %cst_13 : f32 to vector<8x192xf32>
    %37 = arith.addf %36, %35 : vector<8x192xf32>
    %38 = arith.divf %36, %37 : vector<8x192xf32>
    %39 = vector.extract_strided_slice %32 {offsets = [0, 192], sizes = [8, 64], strides = [1, 1]} : vector<8x256xf32> to vector<8x64xf32>
    %40 = math.tanh %39 : vector<8x64xf32>
    %41 = vector.extract_strided_slice %38 {offsets = [0, 64], sizes = [8, 64], strides = [1, 1]} : vector<8x192xf32> to vector<8x64xf32>
    %42 = arith.mulf %41, %25 : vector<8x64xf32>
    %43 = vector.extract_strided_slice %38 {offsets = [0, 0], sizes = [8, 64], strides = [1, 1]} : vector<8x192xf32> to vector<8x64xf32>
    %44 = arith.mulf %43, %40 : vector<8x64xf32>
    %45 = arith.addf %42, %44 : vector<8x64xf32>
    %46 = vector.extract_strided_slice %38 {offsets = [0, 128], sizes = [8, 64], strides = [1, 1]} : vector<8x192xf32> to vector<8x64xf32>
    %47 = math.tanh %45 : vector<8x64xf32>
    %48 = arith.mulf %46, %47 : vector<8x64xf32>
    %49 = arith.addf %29, %48 : vector<8x64xf32>
    %50 = vector.extract_strided_slice %5 {offsets = [16, 0], sizes = [8, 256], strides = [1, 1]} : vector<64x256xf32> to vector<8x256xf32>
    %cst_14 = arith.constant dense<0.000000e+00> : vector<8x256xf32>
    %51 = tpu.matmul %48, %6, %cst_14 {dimension_numbers = #tpu.dot_dimension_numbers<[1], [0], [0], [1], [0, 0, 1, 1], [], []>} : vector<8x64xf32>, vector<64x256xf32>, vector<8x256xf32> -> vector<8x256xf32>
    %52 = arith.addf %50, %51 : vector<8x256xf32>
    %53 = vector.extract_strided_slice %52 {offsets = [0, 0], sizes = [8, 192], strides = [1, 1]} : vector<8x256xf32> to vector<8x192xf32>
    %54 = arith.negf %53 : vector<8x192xf32>
    %55 = math.exp %54 : vector<8x192xf32>
    %cst_15 = arith.constant 1.000000e+00 : f32
    %56 = vector.broadcast %cst_15 : f32 to vector<8x192xf32>
    %57 = arith.addf %56, %55 : vector<8x192xf32>
    %58 = arith.divf %56, %57 : vector<8x192xf32>
    %59 = vector.extract_strided_slice %52 {offsets = [0, 192], sizes = [8, 64], strides = [1, 1]} : vector<8x256xf32> to vector<8x64xf32>
    %60 = math.tanh %59 : vector<8x64xf32>
    %61 = vector.extract_strided_slice %58 {offsets = [0, 64], sizes = [8, 64], strides = [1, 1]} : vector<8x192xf32> to vector<8x64xf32>
    %62 = arith.mulf %61, %45 : vector<8x64xf32>
    %63 = vector.extract_strided_slice %58 {offsets = [0, 0], sizes = [8, 64], strides = [1, 1]} : vector<8x192xf32> to vector<8x64xf32>
    %64 = arith.mulf %63, %60 : vector<8x64xf32>
    %65 = arith.addf %62, %64 : vector<8x64xf32>
    %66 = vector.extract_strided_slice %58 {offsets = [0, 128], sizes = [8, 64], strides = [1, 1]} : vector<8x192xf32> to vector<8x64xf32>
    %67 = math.tanh %65 : vector<8x64xf32>
    %68 = arith.mulf %66, %67 : vector<8x64xf32>
    %69 = arith.addf %49, %68 : vector<8x64xf32>
    %70 = vector.extract_strided_slice %5 {offsets = [24, 0], sizes = [8, 256], strides = [1, 1]} : vector<64x256xf32> to vector<8x256xf32>
    %cst_16 = arith.constant dense<0.000000e+00> : vector<8x256xf32>
    %71 = tpu.matmul %68, %6, %cst_16 {dimension_numbers = #tpu.dot_dimension_numbers<[1], [0], [0], [1], [0, 0, 1, 1], [], []>} : vector<8x64xf32>, vector<64x256xf32>, vector<8x256xf32> -> vector<8x256xf32>
    %72 = arith.addf %70, %71 : vector<8x256xf32>
    %73 = vector.extract_strided_slice %72 {offsets = [0, 0], sizes = [8, 192], strides = [1, 1]} : vector<8x256xf32> to vector<8x192xf32>
    %74 = arith.negf %73 : vector<8x192xf32>
    %75 = math.exp %74 : vector<8x192xf32>
    %cst_17 = arith.constant 1.000000e+00 : f32
    %76 = vector.broadcast %cst_17 : f32 to vector<8x192xf32>
    %77 = arith.addf %76, %75 : vector<8x192xf32>
    %78 = arith.divf %76, %77 : vector<8x192xf32>
    %79 = vector.extract_strided_slice %72 {offsets = [0, 192], sizes = [8, 64], strides = [1, 1]} : vector<8x256xf32> to vector<8x64xf32>
    %80 = math.tanh %79 : vector<8x64xf32>
    %81 = vector.extract_strided_slice %78 {offsets = [0, 64], sizes = [8, 64], strides = [1, 1]} : vector<8x192xf32> to vector<8x64xf32>
    %82 = arith.mulf %81, %65 : vector<8x64xf32>
    %83 = vector.extract_strided_slice %78 {offsets = [0, 0], sizes = [8, 64], strides = [1, 1]} : vector<8x192xf32> to vector<8x64xf32>
    %84 = arith.mulf %83, %80 : vector<8x64xf32>
    %85 = arith.addf %82, %84 : vector<8x64xf32>
    %86 = vector.extract_strided_slice %78 {offsets = [0, 128], sizes = [8, 64], strides = [1, 1]} : vector<8x192xf32> to vector<8x64xf32>
    %87 = math.tanh %85 : vector<8x64xf32>
    %88 = arith.mulf %86, %87 : vector<8x64xf32>
    %89 = arith.addf %69, %88 : vector<8x64xf32>
    %90 = vector.extract_strided_slice %5 {offsets = [32, 0], sizes = [8, 256], strides = [1, 1]} : vector<64x256xf32> to vector<8x256xf32>
    %cst_18 = arith.constant dense<0.000000e+00> : vector<8x256xf32>
    %91 = tpu.matmul %88, %6, %cst_18 {dimension_numbers = #tpu.dot_dimension_numbers<[1], [0], [0], [1], [0, 0, 1, 1], [], []>} : vector<8x64xf32>, vector<64x256xf32>, vector<8x256xf32> -> vector<8x256xf32>
    %92 = arith.addf %90, %91 : vector<8x256xf32>
    %93 = vector.extract_strided_slice %92 {offsets = [0, 0], sizes = [8, 192], strides = [1, 1]} : vector<8x256xf32> to vector<8x192xf32>
    %94 = arith.negf %93 : vector<8x192xf32>
    %95 = math.exp %94 : vector<8x192xf32>
    %cst_19 = arith.constant 1.000000e+00 : f32
    %96 = vector.broadcast %cst_19 : f32 to vector<8x192xf32>
    %97 = arith.addf %96, %95 : vector<8x192xf32>
    %98 = arith.divf %96, %97 : vector<8x192xf32>
    %99 = vector.extract_strided_slice %92 {offsets = [0, 192], sizes = [8, 64], strides = [1, 1]} : vector<8x256xf32> to vector<8x64xf32>
    %100 = math.tanh %99 : vector<8x64xf32>
    %101 = vector.extract_strided_slice %98 {offsets = [0, 64], sizes = [8, 64], strides = [1, 1]} : vector<8x192xf32> to vector<8x64xf32>
    %102 = arith.mulf %101, %85 : vector<8x64xf32>
    %103 = vector.extract_strided_slice %98 {offsets = [0, 0], sizes = [8, 64], strides = [1, 1]} : vector<8x192xf32> to vector<8x64xf32>
    %104 = arith.mulf %103, %100 : vector<8x64xf32>
    %105 = arith.addf %102, %104 : vector<8x64xf32>
    %106 = vector.extract_strided_slice %98 {offsets = [0, 128], sizes = [8, 64], strides = [1, 1]} : vector<8x192xf32> to vector<8x64xf32>
    %107 = math.tanh %105 : vector<8x64xf32>
    %108 = arith.mulf %106, %107 : vector<8x64xf32>
    %109 = arith.addf %89, %108 : vector<8x64xf32>
    %110 = vector.extract_strided_slice %5 {offsets = [40, 0], sizes = [8, 256], strides = [1, 1]} : vector<64x256xf32> to vector<8x256xf32>
    %cst_20 = arith.constant dense<0.000000e+00> : vector<8x256xf32>
    %111 = tpu.matmul %108, %6, %cst_20 {dimension_numbers = #tpu.dot_dimension_numbers<[1], [0], [0], [1], [0, 0, 1, 1], [], []>} : vector<8x64xf32>, vector<64x256xf32>, vector<8x256xf32> -> vector<8x256xf32>
    %112 = arith.addf %110, %111 : vector<8x256xf32>
    %113 = vector.extract_strided_slice %112 {offsets = [0, 0], sizes = [8, 192], strides = [1, 1]} : vector<8x256xf32> to vector<8x192xf32>
    %114 = arith.negf %113 : vector<8x192xf32>
    %115 = math.exp %114 : vector<8x192xf32>
    %cst_21 = arith.constant 1.000000e+00 : f32
    %116 = vector.broadcast %cst_21 : f32 to vector<8x192xf32>
    %117 = arith.addf %116, %115 : vector<8x192xf32>
    %118 = arith.divf %116, %117 : vector<8x192xf32>
    %119 = vector.extract_strided_slice %112 {offsets = [0, 192], sizes = [8, 64], strides = [1, 1]} : vector<8x256xf32> to vector<8x64xf32>
    %120 = math.tanh %119 : vector<8x64xf32>
    %121 = vector.extract_strided_slice %118 {offsets = [0, 64], sizes = [8, 64], strides = [1, 1]} : vector<8x192xf32> to vector<8x64xf32>
    %122 = arith.mulf %121, %105 : vector<8x64xf32>
    %123 = vector.extract_strided_slice %118 {offsets = [0, 0], sizes = [8, 64], strides = [1, 1]} : vector<8x192xf32> to vector<8x64xf32>
    %124 = arith.mulf %123, %120 : vector<8x64xf32>
    %125 = arith.addf %122, %124 : vector<8x64xf32>
    %126 = vector.extract_strided_slice %118 {offsets = [0, 128], sizes = [8, 64], strides = [1, 1]} : vector<8x192xf32> to vector<8x64xf32>
    %127 = math.tanh %125 : vector<8x64xf32>
    %128 = arith.mulf %126, %127 : vector<8x64xf32>
    %129 = arith.addf %109, %128 : vector<8x64xf32>
    %130 = vector.extract_strided_slice %5 {offsets = [48, 0], sizes = [8, 256], strides = [1, 1]} : vector<64x256xf32> to vector<8x256xf32>
    %cst_22 = arith.constant dense<0.000000e+00> : vector<8x256xf32>
    %131 = tpu.matmul %128, %6, %cst_22 {dimension_numbers = #tpu.dot_dimension_numbers<[1], [0], [0], [1], [0, 0, 1, 1], [], []>} : vector<8x64xf32>, vector<64x256xf32>, vector<8x256xf32> -> vector<8x256xf32>
    %132 = arith.addf %130, %131 : vector<8x256xf32>
    %133 = vector.extract_strided_slice %132 {offsets = [0, 0], sizes = [8, 192], strides = [1, 1]} : vector<8x256xf32> to vector<8x192xf32>
    %134 = arith.negf %133 : vector<8x192xf32>
    %135 = math.exp %134 : vector<8x192xf32>
    %cst_23 = arith.constant 1.000000e+00 : f32
    %136 = vector.broadcast %cst_23 : f32 to vector<8x192xf32>
    %137 = arith.addf %136, %135 : vector<8x192xf32>
    %138 = arith.divf %136, %137 : vector<8x192xf32>
    %139 = vector.extract_strided_slice %132 {offsets = [0, 192], sizes = [8, 64], strides = [1, 1]} : vector<8x256xf32> to vector<8x64xf32>
    %140 = math.tanh %139 : vector<8x64xf32>
    %141 = vector.extract_strided_slice %138 {offsets = [0, 64], sizes = [8, 64], strides = [1, 1]} : vector<8x192xf32> to vector<8x64xf32>
    %142 = arith.mulf %141, %125 : vector<8x64xf32>
    %143 = vector.extract_strided_slice %138 {offsets = [0, 0], sizes = [8, 64], strides = [1, 1]} : vector<8x192xf32> to vector<8x64xf32>
    %144 = arith.mulf %143, %140 : vector<8x64xf32>
    %145 = arith.addf %142, %144 : vector<8x64xf32>
    %146 = vector.extract_strided_slice %138 {offsets = [0, 128], sizes = [8, 64], strides = [1, 1]} : vector<8x192xf32> to vector<8x64xf32>
    %147 = math.tanh %145 : vector<8x64xf32>
    %148 = arith.mulf %146, %147 : vector<8x64xf32>
    %149 = arith.addf %129, %148 : vector<8x64xf32>
    %150 = vector.extract_strided_slice %5 {offsets = [56, 0], sizes = [8, 256], strides = [1, 1]} : vector<64x256xf32> to vector<8x256xf32>
    %cst_24 = arith.constant dense<0.000000e+00> : vector<8x256xf32>
    %151 = tpu.matmul %148, %6, %cst_24 {dimension_numbers = #tpu.dot_dimension_numbers<[1], [0], [0], [1], [0, 0, 1, 1], [], []>} : vector<8x64xf32>, vector<64x256xf32>, vector<8x256xf32> -> vector<8x256xf32>
    %152 = arith.addf %150, %151 : vector<8x256xf32>
    %153 = vector.extract_strided_slice %152 {offsets = [0, 0], sizes = [8, 192], strides = [1, 1]} : vector<8x256xf32> to vector<8x192xf32>
    %154 = arith.negf %153 : vector<8x192xf32>
    %155 = math.exp %154 : vector<8x192xf32>
    %cst_25 = arith.constant 1.000000e+00 : f32
    %156 = vector.broadcast %cst_25 : f32 to vector<8x192xf32>
    %157 = arith.addf %156, %155 : vector<8x192xf32>
    %158 = arith.divf %156, %157 : vector<8x192xf32>
    %159 = vector.extract_strided_slice %152 {offsets = [0, 192], sizes = [8, 64], strides = [1, 1]} : vector<8x256xf32> to vector<8x64xf32>
    %160 = math.tanh %159 : vector<8x64xf32>
    %161 = vector.extract_strided_slice %158 {offsets = [0, 64], sizes = [8, 64], strides = [1, 1]} : vector<8x192xf32> to vector<8x64xf32>
    %162 = arith.mulf %161, %145 : vector<8x64xf32>
    %163 = vector.extract_strided_slice %158 {offsets = [0, 0], sizes = [8, 64], strides = [1, 1]} : vector<8x192xf32> to vector<8x64xf32>
    %164 = arith.mulf %163, %160 : vector<8x64xf32>
    %165 = arith.addf %162, %164 : vector<8x64xf32>
    %166 = vector.extract_strided_slice %158 {offsets = [0, 128], sizes = [8, 64], strides = [1, 1]} : vector<8x192xf32> to vector<8x64xf32>
    %167 = math.tanh %165 : vector<8x64xf32>
    %168 = arith.mulf %166, %167 : vector<8x64xf32>
    %169 = arith.addf %149, %168 : vector<8x64xf32>
    %cst_26 = arith.constant 1.250000e-01 : f32
    %170 = vector.broadcast %cst_26 : f32 to vector<8x64xf32>
    %171 = arith.mulf %169, %170 : vector<8x64xf32>
    %c0_27 = arith.constant 0 : index
    %c0_28 = arith.constant 0 : index
    %172 = vector.load %arg4[%c0_27, %c0_28] : memref<64x32xf32, #tpu.memory_space<vmem>>, vector<64x32xf32>
    %cst_29 = arith.constant dense<0.000000e+00> : vector<8x32xf32>
    %173 = tpu.matmul %171, %172, %cst_29 {dimension_numbers = #tpu.dot_dimension_numbers<[1], [0], [0], [1], [0, 0, 1, 1], [], []>} : vector<8x64xf32>, vector<64x32xf32>, vector<8x32xf32> -> vector<8x32xf32>
    %c0_30 = arith.constant 0 : index
    %c0_31 = arith.constant 0 : index
    %174 = vector.load %arg5[%c0_30, %c0_31] : memref<1x32xf32, #tpu.memory_space<vmem>>, vector<1x32xf32>
    %175 = vector.broadcast %174 : vector<1x32xf32> to vector<8x32xf32>
    %176 = arith.addf %173, %175 : vector<8x32xf32>
    %cst_32 = arith.constant 0.000000e+00 : f32
    %177 = vector.broadcast %cst_32 : f32 to vector<8x32xf32>
    %178 = arith.maximumf %176, %177 : vector<8x32xf32>
    %c0_33 = arith.constant 0 : index
    %c0_34 = arith.constant 0 : index
    %179 = vector.load %arg6[%c0_33, %c0_34] : memref<32x32xf32, #tpu.memory_space<vmem>>, vector<32x32xf32>
    %cst_35 = arith.constant dense<0.000000e+00> : vector<8x32xf32>
    %180 = tpu.matmul %178, %179, %cst_35 {dimension_numbers = #tpu.dot_dimension_numbers<[1], [0], [0], [1], [0, 0, 1, 1], [], []>} : vector<8x32xf32>, vector<32x32xf32>, vector<8x32xf32> -> vector<8x32xf32>
    %c0_36 = arith.constant 0 : index
    %c0_37 = arith.constant 0 : index
    %181 = vector.load %arg7[%c0_36, %c0_37] : memref<1x32xf32, #tpu.memory_space<vmem>>, vector<1x32xf32>
    %182 = vector.broadcast %181 : vector<1x32xf32> to vector<8x32xf32>
    %183 = arith.addf %180, %182 : vector<8x32xf32>
    %c0_38 = arith.constant 0 : index
    %c0_39 = arith.constant 0 : index
    %184 = vector.load %arg8[%c0_38, %c0_39] : memref<8x32xf32, #tpu.memory_space<vmem>>, vector<8x32xf32>
    tpu.vector_store %arg8[%c0_38, %c0_39], %183 {strides = array<i32>} : memref<8x32xf32, #tpu.memory_space<vmem>>, vector<8x32xf32>,
    return
  }
}

</mosaic_0001>

<bundles_post_ra>
// kernel: _encode_jit.1
= control target key start
LH: loop header
LB: loop body
LE: loop exit
PB: predicated region body
PF: predicated region fallthrough
CT: control target
= control target key end

     0   :  { %s1771_s0 = inlined_call_operand.vmem [shape: f32[64,64], index: 0, kind: input, shape index: {}]   ;;  %s1772_s1 = inlined_call_operand.vmem [shape: f32[64,256], index: 1, kind: input, shape index: {}]   ;;  %s1773_s2 = inlined_call_operand.vmem [shape: f32[64,256], index: 2, kind: input, shape index: {}]   ;;  %s1774_s3 = inlined_call_operand.vmem [shape: f32[1,256], index: 3, kind: input, shape index: {}]   ;;  %s1775_s4 = inlined_call_operand.vmem [shape: f32[64,32], index: 4, kind: input, shape index: {}]   ;;  %s1776_s5 = inlined_call_operand.vmem [shape: f32[1,32], index: 5, kind: input, shape index: {}]   ;;  %s1777_s6 = inlined_call_operand.vmem [shape: f32[32,32], index: 6, kind: input, shape index: {}]   ;;  %s1778_s7 = inlined_call_operand.vmem [shape: f32[1,32], index: 7, kind: input, shape index: {}]   ;;  %s1779_s8 = inlined_call_operand.hbm [shape: f32[8,32], index: 8, kind: output, shape index: {}]  }
   0x1   :  { %v1311_v0 = vld [vmem:[%s1773_s2 + $0x78] sm:$0xff]  ;;  %v1316_v1 = vld [vmem:[%s1773_s2 + $0x68] sm:$0xff]  ;;  %v1351_v9 = vld [vmem:[%s1773_s2 + $0x70] sm:$0xff] }
   0x2   :  { %v53_v2 = vld [vmem:[%s1772_s1 + $0x78] sm:$0xff]  ;;  %214 = vmatpush.msra.mxu3 %v1311_v0  ;;  %v51_v3 = vld [vmem:[%s1772_s1 + $0x68] sm:$0xff]  ;;  %194 = vmatpush.msra.mxu2 %v1351_v9  ;;  %v1360_v11 = vld [vmem:[%s1773_s2 + $0x60] sm:$0xff] }
   0x3   :  { %134 = vmatpush.msra.mxu1 %v53_v2  ;;  %v1328_v4 = vld [vmem:[%s1773_s2 + $0x58] sm:$0xff]  ;;  %v1337_v6 = vld [vmem:[%s1773_s2 + $0x48] sm:$0xff]  ;;  %v52_v12 = vld [vmem:[%s1772_s1 + $0x70] sm:$0xff] }
   0x4   :  { %v49_v5 = vld [vmem:[%s1772_s1 + $0x58] sm:$0xff]  ;;  %215 = vmatpush.msra.mxu3 %v1316_v1  ;;  %v47_v7 = vld [vmem:[%s1772_s1 + $0x48] sm:$0xff]  ;;  %v1369_v13 = vld [vmem:[%s1773_s2 + $0x50] sm:$0xff]  ;;  %195 = vmatpush.msra.mxu2 %v1360_v11 }
   0x5   :  { %135 = vmatpush.msra.mxu1 %v51_v3  ;;  %v1346_v8 = vld [vmem:[%s1773_s2 + $0x38] sm:$0xff]  ;;  %v50_v14 = vld [vmem:[%s1772_s1 + $0x60] sm:$0xff]  ;;  %v1377_v15 = vld [vmem:[%s1773_s2 + $0x28] sm:$0xff]  ;;  %93 = vmatpush.msra.mxu0 %v52_v12 }
   0x6   :  { %216 = vmatpush.msra.mxu3 %v1328_v4  ;;  %v45_v10 = vld [vmem:[%s1772_s1 + $0x38] sm:$0xff]  ;;  %v43_v16 = vld [vmem:[%s1772_s1 + $0x28] sm:$0xff]  ;;  %v1387_v17 = vld [vmem:[%s1773_s2 + $0x40] sm:$0xff]  ;;  %196 = vmatpush.msra.mxu2 %v1369_v13 }
   0x7   :  { %136 = vmatpush.msra.mxu1 %v49_v5  ;;  %v48_v18 = vld [vmem:[%s1772_s1 + $0x50] sm:$0xff]  ;;  %v1395_v19 = vld [vmem:[%s1773_s2 + $0x18] sm:$0xff]  ;;  %94 = vmatpush.msra.mxu0 %v50_v14  ;;  %v46_v22 = vld [vmem:[%s1772_s1 + $0x40] sm:$0xff] }
   0x8   :  { %217 = vmatpush.msra.mxu3 %v1337_v6  ;;  %v41_v20 = vld [vmem:[%s1772_s1 + $0x18] sm:$0xff]  ;;  %v1404_v21 = vld [vmem:[%s1773_s2 + $0x30] sm:$0xff]  ;;  %v1413_v23 = vld [vmem:[%s1773_s2 + $0x8] sm:$0xff]  ;;  %197 = vmatpush.msra.mxu2 %v1387_v17 }
   0x9   :  { %137 = vmatpush.msra.mxu1 %v47_v7  ;;  %v39_v24 = vld [vmem:[%s1772_s1 + $0x8] sm:$0xff]  ;;  %95 = vmatpush.msra.mxu0 %v48_v18 }
   0xa   :  { %218 = vmatpush.msra.mxu3 %v1346_v8 }
   0xb   :  { %138 = vmatpush.msra.mxu1 %v45_v10 }
   0xc   :  { %219 = vmatpush.msra.mxu3 %v1377_v15 }
   0xd   :  { %139 = vmatpush.msra.mxu1 %v43_v16 }
   0xe   :  { %13 = vsyncpa [#allocation3], 0  ;;  %220 = vmatpush.msra.mxu3 %v1395_v19  ;;  %v30_v25 = vld [vmem:[%s1771_s0] sm:$0xff]  ;;  %vm60_vm0 = vcmask 523264   ;;  %198 = vmatpush.msra.mxu2 %v1404_v21  ;;  %v44_v27 = vld [vmem:[%s1772_s1 + $0x30] sm:$0xff]  ;;  %v1260_v28 = vmov 0.0  }
   0xf   :  { %140 = vmatpush.msra.mxu1 %v41_v20  ;;  %96 = vmatpush.msra.mxu0 %v46_v22  ;;  %v1427_v26 = vld [vmem:[%s1773_s2 + $0x20] sm:$0xff]  ;;  %v1437_v29 = vld [vmem:[%s1773_s2 + $0x10] sm:$0xff]  ;;  %s1261_s27 = smov 64   ;;  %v31_v10 = vld [vmem:[%s1771_s0 + $0x8] sm:$0xff]  ;;  %s1262_s19 = smov [#allocation2]  }
  0x10   :  { %221 = vmatpush.msra.mxu3 %v1413_v23  ;;  %v42_v30 = vld [vmem:[%s1772_s1 + $0x20] sm:$0xff]  ;;  %199 = vmatpush.msra.mxu2 %v1427_v26  ;;  %v40_v32 = vld [vmem:[%s1772_s1 + $0x10] sm:$0xff]  ;;  %s1074_s20 = sshll.u32 %s1262_s19, 4  ;;  %s1075_s20 = int_to_ptr.vmem [resolvable:$true] %s1074_s20 }
  0x11   :  { %141 = vmatpush.msra.mxu1 %v39_v24  ;;  %222 = vmatmul.f32.vlgmr.msra.gmra.mxu3 %v1260_v28  ;;  %v1446_v31 = vld [vmem:[%s1773_s2] sm:$0xff] }
  0x12   :  { %1093 = vmatmul.msk.f32.vlgmr.msra.gmra.mxu1 %vm60_vm0, %v30_v25  ;;  %97 = vmatpush.msra.mxu0 %v44_v27  ;;  %v38_v33 = vld [vmem:[%s1772_s1] sm:$0xff] }
  0x13   :  { %316 = vmatpush.msrb.mxu3 %v1311_v0  ;;  %622 = vmatpush.msrb.mxu1 %v1311_v0  ;;  %v54_v34 = vld [vmem:[%s1774_s3] sm:$0x3] }
  0x14   :  { %200 = vmatpush.msra.mxu2 %v1437_v29  ;;  %98 = vmatpush.msra.mxu0 %v42_v30  ;;  %v1524_v35 = vperm.slane %v54_v34, 1  ;;  %v1528_v41 = vperm.slane %v54_v34, 0 }
  0x15   :  { %317 = vmatpush.msrb.mxu3 %v1316_v1  ;;  %623 = vmatpush.msrb.mxu1 %v1316_v1 }
  0x16   :  { %201 = vmatpush.msra.mxu2 %v1446_v31  ;;  %99 = vmatpush.msra.mxu0 %v40_v32 }
  0x17   :  { %202 = vmatmul.f32.vlgmr.msra.gmra.mxu2 %v1260_v28  ;;  %318 = vmatpush.msrb.mxu3 %v1328_v4 }
  0x18   :  { %100 = vmatpush.msra.mxu0 %v38_v33  ;;  %296 = vmatpush.msrb.mxu2 %v1351_v9 }
  0x19   :  { %1085 = vmatmul.msk.f32.vlgmr.msra.gmra.mxu0 %vm60_vm0, %v30_v25  ;;  %319 = vmatpush.msrb.mxu3 %v1337_v6 }
  0x1a   :  { %297 = vmatpush.msrb.mxu2 %v1360_v11  ;;  %624 = vmatpush.msrb.mxu1 %v1328_v4 }
  0x1b   :  { %320 = vmatpush.msrb.mxu3 %v1346_v8  ;;  %602 = vmatpush.msrb.mxu0 %v1351_v9 }
  0x1c   :  { %298 = vmatpush.msrb.mxu2 %v1369_v13  ;;  %625 = vmatpush.msrb.mxu1 %v1337_v6 }
  0x1d   :  { %321 = vmatpush.msrb.mxu3 %v1377_v15  ;;  %603 = vmatpush.msrb.mxu0 %v1360_v11 }
  0x1e   :  { %299 = vmatpush.msrb.mxu2 %v1387_v17  ;;  %626 = vmatpush.msrb.mxu1 %v1346_v8 }
  0x1f   :  { %322 = vmatpush.msrb.mxu3 %v1395_v19  ;;  %604 = vmatpush.msrb.mxu0 %v1369_v13 }
  0x20   :  { %300 = vmatpush.msrb.mxu2 %v1404_v21  ;;  %627 = vmatpush.msrb.mxu1 %v1377_v15 }
  0x21   :  { %323 = vmatpush.msrb.mxu3 %v1413_v23  ;;  %605 = vmatpush.msrb.mxu0 %v1387_v17 }
  0x22   :  { %301 = vmatpush.msrb.mxu2 %v1427_v26  ;;  %628 = vmatpush.msrb.mxu1 %v1395_v19 }
  0x23   :  { %418 = vmatpush.msra.mxu3 %v1311_v0  ;;  %606 = vmatpush.msrb.mxu0 %v1404_v21 }
  0x24   :  { %302 = vmatpush.msrb.mxu2 %v1437_v29  ;;  %629 = vmatpush.msrb.mxu1 %v1413_v23 }
  0x25   :  { %419 = vmatpush.msra.mxu3 %v1316_v1  ;;  %607 = vmatpush.msrb.mxu0 %v1427_v26 }
  0x26   :  { %303 = vmatpush.msrb.mxu2 %v1446_v31  ;;  %826 = vmatpush.msra.mxu1 %v1311_v0 }
  0x27   :  { %420 = vmatpush.msra.mxu3 %v1328_v4  ;;  %608 = vmatpush.msrb.mxu0 %v1437_v29 }
  0x28   :  { %398 = vmatpush.msra.mxu2 %v1351_v9  ;;  %827 = vmatpush.msra.mxu1 %v1316_v1 }
  0x29   :  { %421 = vmatpush.msra.mxu3 %v1337_v6  ;;  %609 = vmatpush.msrb.mxu0 %v1446_v31 }
  0x2a   :  { %399 = vmatpush.msra.mxu2 %v1360_v11  ;;  %828 = vmatpush.msra.mxu1 %v1328_v4 }
  0x2b   :  { %422 = vmatpush.msra.mxu3 %v1346_v8  ;;  %806 = vmatpush.msra.mxu0 %v1351_v9 }
  0x2c   :  { %400 = vmatpush.msra.mxu2 %v1369_v13  ;;  %829 = vmatpush.msra.mxu1 %v1337_v6 }
  0x2d   :  { %423 = vmatpush.msra.mxu3 %v1377_v15  ;;  %807 = vmatpush.msra.mxu0 %v1360_v11 }
  0x2e   :  { %401 = vmatpush.msra.mxu2 %v1387_v17  ;;  %830 = vmatpush.msra.mxu1 %v1346_v8 }
  0x2f   :  { %424 = vmatpush.msra.mxu3 %v1395_v19  ;;  %808 = vmatpush.msra.mxu0 %v1369_v13 }
  0x30   :  { %402 = vmatpush.msra.mxu2 %v1404_v21  ;;  %831 = vmatpush.msra.mxu1 %v1377_v15 }
  0x31   :  { %425 = vmatpush.msra.mxu3 %v1413_v23  ;;  %809 = vmatpush.msra.mxu0 %v1387_v17 }
  0x32   :  { %403 = vmatpush.msra.mxu2 %v1427_v26  ;;  %832 = vmatpush.msra.mxu1 %v1395_v19 }
  0x33   :  { %810 = vmatpush.msra.mxu0 %v1404_v21  ;;  %1094 = vmatmul.msk.f32.gmra.mxu1 %vm60_vm0, %v31_v10 }
  0x34   :  { %404 = vmatpush.msra.mxu2 %v1437_v29  ;;  %833 = vmatpush.msra.mxu1 %v1413_v23 }
  0x35   :  { %811 = vmatpush.msra.mxu0 %v1427_v26 }
  0x36   :  { %405 = vmatpush.msra.mxu2 %v1446_v31  ;;  %1086 = vmatmul.msk.f32.gmra.mxu0 %vm60_vm0, %v31_v10 }
  0x37   :  { %812 = vmatpush.msra.mxu0 %v1437_v29 }
  0x39   :  { %813 = vmatpush.msra.mxu0 %v1446_v31 }
  0x8f   :  { %v143_v36 = vpop.f32.mrf.mxu1 }
  0x90   :  { %v144_v37 = vadd.f32 %v143_v36, %v1524_v35 }
  0x94   :  { %v223_v38 = vpop.f32.mrf.mxu3 }
  0x95   :  { %v227_v39 = vadd.f32 %v223_v38, %v144_v37 }
  0x96   :  { %v102_v42 = vpop.f32.mrf.mxu0 }
  0x97   :  { %1138 = vtanh.f32 %v227_v39  ;;  %v103_v43 = vadd.f32 %v102_v42, %v1528_v41  ;;  %v1102_v3 = vmul.f32 -1.442695, %v227_v39 }
  0x9a   :  { %v203_v44 = vpop.f32.mrf.mxu2 }
  0x9b   :  { %v226_v45 = vadd.f32 %v203_v44, %v103_v43 }
  0x9d   :  { %v1139_v40 = vpop.eup %1138  ;;  %v1101_v46 = vmul.f32 -1.442695, %v226_v45 }
  0x9e   :  { %269 = vrot.lane.b32.xlu0 %v1139_v40, %s1261_s27 }
  0x9f   :  { %1140 = vpow2.f32 %v1101_v46 }
  0xa5   :  { %v1141_v47 = vpop.eup %1140 }
  0xa6   :  { %v234_v48 = vadd.f32 1.0, %v1141_v47 }
  0xa8   :  { %1142 = vrcp.f32 %v234_v48  ;;  %vm241_vm1 = vweird.f32 %v234_v48  ;;  %v247_v53 = vand.u32 2147483648, %v234_v48  ;;  %v245_v55 = vand.u32 2147483647, %v234_v48 }
  0xaa   :  { %v248_v56 = vor.u32 1.1754944e-38, %v247_v53  ;;  %vm246_vm4 = vcmp.eq.f32.partialorder %v245_v55, 8.507059e+37 }
  0xae   :  { %v1143_v49 = vpop.eup %1142 }
  0xaf   :  { %v237_v50 = vmul.f32 %v1143_v49, %v234_v48  ;;  %vm242_vm2 = vweird.f32 %v1143_v49 }
  0xb0   :  { %vm243_vm3 = vmor %vm241_vm1, %vm242_vm2  ;;  %v146_v33 = vpop.f32.mrf.mxu1 }
  0xb1   :  { %v238_v51 = vsub.f32 1.0, %v237_v50  ;;  %v147_v34 = vadd.f32 %v146_v33, %v1524_v35 }
  0xb3   :  { %v239_v52 = vmul.f32 %v1143_v49, %v238_v51  ;;  %v105_v39 = vpop.f32.mrf.mxu0 }
  0xb4   :  { %v106_v40 = vadd.f32 %v105_v39, %v1528_v41 }
  0xb5   :  { %v240_v54 = vadd.f32 %v1143_v49, %v239_v52 }
  0xb7   :  { %v244_v57 = vsel %vm243_vm3, %v1143_v49, %v240_v54 }
  0xb8   :  { %v249_v59 = vsel %vm246_vm4, %v248_v56, %v244_v57 }
  0xb9   :  { %v267_v61 = vmul.f32 0.0, %v249_v59 }
 0x110   :  { %v270_v58 = vpop.permute.xlu0 %269 }
 0x111   :  { %v272_v60 = vmul.f32 %v270_v58, %v249_v59 }
 0x113   :  { %274 = vrot.lane.b32.xlu0 %v272_v60, %s1261_s27 }
 0x185   :  { %v275_v62 = vpop.permute.xlu0 %274 }
 0x186   :  { %v1532_v63 = vadd.f32 %v275_v62, %v267_v61 }
 0x188   :  { %1144 = vtanh.f32 %v1532_v63 }
 0x189   :  { %1146 = vpow2.f32 %v1102_v3 }
 0x18e   :  { %v1145_v2 = vpop.eup %1144 }
 0x18f   :  { %280 = vrot.lane.b32.xlu1 %v1145_v2, %s1261_s27  ;;  %v1147_v5 = vpop.eup %1146 }
 0x190   :  { %v235_v7 = vadd.f32 1.0, %v1147_v5 }
 0x192   :  { %1148 = vrcp.f32 %v235_v7  ;;  %v262_v22 = vand.u32 2147483648, %v235_v7  ;;  %vm256_vm6 = vweird.f32 %v235_v7  ;;  %v260_v24 = vand.u32 2147483647, %v235_v7 }
 0x194   :  { %v263_v27 = vor.u32 1.1754944e-38, %v262_v22  ;;  %vm261_vm8 = vcmp.eq.f32.partialorder %v260_v24, 8.507059e+37 }
 0x198   :  { %v1149_v12 = vpop.eup %1148 }
 0x199   :  { %v252_v14 = vmul.f32 %v1149_v12, %v235_v7  ;;  %vm257_vm5 = vweird.f32 %v1149_v12  ;;  %v32_v7 = vld [vmem:[%s1771_s0 + $0x10] sm:$0xff] }
 0x19a   :  { %vm258_vm7 = vmor %vm256_vm6, %vm257_vm5  ;;  %1087 = vmatmul.msk.f32.gmra.mxu0 %vm60_vm0, %v32_v7  ;;  %1095 = vmatmul.msk.f32.gmra.mxu1 %vm60_vm0, %v32_v7  ;;  %v33_v7 = vld [vmem:[%s1771_s0 + $0x18] sm:$0xff] }
 0x19b   :  { %v253_v16 = vsub.f32 1.0, %v252_v14 }
 0x19d   :  { %v254_v18 = vmul.f32 %v1149_v12, %v253_v16 }
 0x19f   :  { %v255_v20 = vadd.f32 %v1149_v12, %v254_v18 }
 0x1a1   :  { %v259_v25 = vsel %vm258_vm7, %v1149_v12, %v255_v20 }
 0x1a2   :  { %v264_v28 = vsel %vm261_vm8, %v263_v27, %v259_v25  ;;  %1088 = vmatmul.msk.f32.gmra.mxu0 %vm60_vm0, %v33_v7  ;;  %1096 = vmatmul.msk.f32.gmra.mxu1 %vm60_vm0, %v33_v7 }
 0x201   :  { %v281_v30 = vpop.permute.xlu1 %280 }
 0x202   :  { %v1541_v32 = vmul.f32 %v281_v30, %v264_v28 }
 0x204   :  { %1103 = vmatmul.msk.f32.vlgmr.msrb.gmra.mxu2 %vm60_vm0, %v1541_v32  ;;  %1104 = vmatmul.msk.f32.vlgmr.msrb.gmra.mxu3 %vm60_vm0, %v1541_v32 }
 0x205   :  { %500 = vmatpush.msrb.mxu2 %v1351_v9  ;;  %520 = vmatpush.msrb.mxu3 %v1311_v0 }
 0x207   :  { %501 = vmatpush.msrb.mxu2 %v1360_v11  ;;  %521 = vmatpush.msrb.mxu3 %v1316_v1 }
 0x209   :  { %502 = vmatpush.msrb.mxu2 %v1369_v13  ;;  %522 = vmatpush.msrb.mxu3 %v1328_v4 }
 0x20b   :  { %503 = vmatpush.msrb.mxu2 %v1387_v17  ;;  %523 = vmatpush.msrb.mxu3 %v1337_v6 }
 0x20d   :  { %504 = vmatpush.msrb.mxu2 %v1404_v21  ;;  %524 = vmatpush.msrb.mxu3 %v1346_v8 }
 0x20f   :  { %505 = vmatpush.msrb.mxu2 %v1427_v26  ;;  %525 = vmatpush.msrb.mxu3 %v1377_v15 }
 0x211   :  { %506 = vmatpush.msrb.mxu2 %v1437_v29  ;;  %526 = vmatpush.msrb.mxu3 %v1395_v19 }
 0x213   :  { %507 = vmatpush.msrb.mxu2 %v1446_v31  ;;  %527 = vmatpush.msrb.mxu3 %v1413_v23 }
 0x217   :  { %v149_v30 = vpop.f32.mrf.mxu1 }
 0x218   :  { %v150_v33 = vadd.f32 %v149_v30, %v1524_v35 }
 0x287   :  { %v325_v36 = vpop.f32.mrf.mxu3  ;;  %v305_v42 = vpop.f32.mrf.mxu2 }
 0x288   :  { %v329_v37 = vadd.f32 %v325_v36, %v147_v34  ;;  %v328_v43 = vadd.f32 %v305_v42, %v106_v40 }
 0x28a   :  { %1150 = vtanh.f32 %v329_v37  ;;  %v1105_v44 = vmul.f32 -1.442695, %v328_v43  ;;  %v1106_v2 = vmul.f32 -1.442695, %v329_v37 }
 0x28c   :  { %1152 = vpow2.f32 %v1105_v44 }
 0x290   :  { %v1151_v38 = vpop.eup %1150 }
 0x291   :  { %371 = vrot.lane.b32.xlu1 %v1151_v38, %s1261_s27  ;;  %v108_v38 = vpop.f32.mrf.mxu0 }
 0x292   :  { %v1153_v45 = vpop.eup %1152  ;;  %v109_v39 = vadd.f32 %v108_v38, %v1528_v41 }
 0x293   :  { %v336_v46 = vadd.f32 1.0, %v1153_v45 }
 0x295   :  { %1154 = vrcp.f32 %v336_v46  ;;  %v349_v52 = vand.u32 2147483648, %v336_v46  ;;  %vm343_vm10 = vweird.f32 %v336_v46  ;;  %v347_v53 = vand.u32 2147483647, %v336_v46 }
 0x297   :  { %v350_v55 = vor.u32 1.1754944e-38, %v349_v52  ;;  %vm348_vm12 = vcmp.eq.f32.partialorder %v347_v53, 8.507059e+37 }
 0x29b   :  { %v1155_v47 = vpop.eup %1154 }
 0x29c   :  { %v339_v48 = vmul.f32 %v1155_v47, %v336_v46  ;;  %vm344_vm9 = vweird.f32 %v1155_v47 }
 0x29d   :  { %vm345_vm11 = vmor %vm343_vm10, %vm344_vm9 }
 0x29e   :  { %v340_v49 = vsub.f32 1.0, %v339_v48 }
 0x2a0   :  { %v341_v50 = vmul.f32 %v1155_v47, %v340_v49 }
 0x2a2   :  { %v342_v51 = vadd.f32 %v1155_v47, %v341_v50 }
 0x2a4   :  { %v346_v54 = vsel %vm345_vm11, %v1155_v47, %v342_v51 }
 0x2a5   :  { %v351_v57 = vsel %vm348_vm12, %v350_v55, %v346_v54 }
 0x2a6   :  { %v369_v59 = vmul.f32 %v351_v57, %v1532_v63 }
 0x303   :  { %v372_v56 = vpop.permute.xlu1 %371 }
 0x304   :  { %v374_v58 = vmul.f32 %v372_v56, %v351_v57 }
 0x306   :  { %376 = vrot.lane.b32.xlu2 %v374_v58, %s1261_s27 }
 0x360   :  { %v377_v60 = vpop.permute.xlu2 %376 }
 0x361   :  { %v1568_v61 = vadd.f32 %v377_v60, %v369_v59 }
 0x363   :  { %1156 = vtanh.f32 %v1568_v61 }
 0x364   :  { %1158 = vpow2.f32 %v1106_v2 }
 0x369   :  { %v1157_v62 = vpop.eup %1156 }
 0x36a   :  { %382 = vrot.lane.b32.xlu2 %v1157_v62, %s1261_s27  ;;  %v1159_v3 = vpop.eup %1158 }
 0x36b   :  { %v337_v5 = vadd.f32 1.0, %v1159_v3 }
 0x36d   :  { %1160 = vrcp.f32 %v337_v5  ;;  %v364_v18 = vand.u32 2147483648, %v337_v5  ;;  %vm358_vm14 = vweird.f32 %v337_v5  ;;  %v362_v20 = vand.u32 2147483647, %v337_v5 }
 0x36f   :  { %v365_v24 = vor.u32 1.1754944e-38, %v364_v18  ;;  %vm363_vm1 = vcmp.eq.f32.partialorder %v362_v20, 8.507059e+37 }
 0x373   :  { %v1161_v63 = vpop.eup %1160 }
 0x374   :  { %v354_v10 = vmul.f32 %v1161_v63, %v337_v5  ;;  %vm359_vm13 = vweird.f32 %v1161_v63 }
 0x375   :  { %vm360_vm15 = vmor %vm358_vm14, %vm359_vm13 }
 0x376   :  { %v355_v12 = vsub.f32 1.0, %v354_v10 }
 0x378   :  { %v356_v14 = vmul.f32 %v1161_v63, %v355_v12 }
 0x37a   :  { %v357_v16 = vadd.f32 %v1161_v63, %v356_v14 }
 0x37c   :  { %v361_v22 = vsel %vm360_vm15, %v1161_v63, %v357_v16 }
 0x37d   :  { %v366_v25 = vsel %vm363_vm1, %v365_v24, %v361_v22 }
 0x3c4   :  { %v383_v27 = vpop.permute.xlu2 %382 }
 0x3c5   :  { %v1577_v28 = vmul.f32 %v383_v27, %v366_v25 }
 0x3c7   :  { %1107 = vmatmul.msk.f32.vlgmr.msra.gmra.mxu2 %vm60_vm0, %v1577_v28  ;;  %1108 = vmatmul.msk.f32.vlgmr.msra.gmra.mxu3 %vm60_vm0, %v1577_v28  ;;  %v386_v27 = vadd.f32 %v1577_v28, %v1541_v32 }
 0x3c8   :  { %704 = vmatpush.msra.mxu2 %v1351_v9  ;;  %724 = vmatpush.msra.mxu3 %v1311_v0 }
 0x3ca   :  { %705 = vmatpush.msra.mxu2 %v1360_v11  ;;  %725 = vmatpush.msra.mxu3 %v1316_v1 }
 0x3cc   :  { %706 = vmatpush.msra.mxu2 %v1369_v13  ;;  %726 = vmatpush.msra.mxu3 %v1328_v4 }
 0x3ce   :  { %707 = vmatpush.msra.mxu2 %v1387_v17  ;;  %727 = vmatpush.msra.mxu3 %v1337_v6 }
 0x3d0   :  { %708 = vmatpush.msra.mxu2 %v1404_v21  ;;  %728 = vmatpush.msra.mxu3 %v1346_v8 }
 0x3d2   :  { %709 = vmatpush.msra.mxu2 %v1427_v26  ;;  %729 = vmatpush.msra.mxu3 %v1377_v15 }
 0x3d4   :  { %710 = vmatpush.msra.mxu2 %v1437_v29  ;;  %730 = vmatpush.msra.mxu3 %v1395_v19 }
 0x3d6   :  { %711 = vmatpush.msra.mxu2 %v1446_v31  ;;  %731 = vmatpush.msra.mxu3 %v1413_v23 }
 0x44a   :  { %v427_v34 = vpop.f32.mrf.mxu3  ;;  %v407_v40 = vpop.f32.mrf.mxu2 }
 0x44b   :  { %v431_v36 = vadd.f32 %v427_v34, %v150_v33  ;;  %v430_v42 = vadd.f32 %v407_v40, %v109_v39 }
 0x44d   :  { %1162 = vtanh.f32 %v431_v36  ;;  %v1109_v43 = vmul.f32 -1.442695, %v430_v42  ;;  %v1110_v2 = vmul.f32 -1.442695, %v431_v36  ;;  %v34_v42 = vld [vmem:[%s1771_s0 + $0x20] sm:$0xff] }
 0x44e   :  { %1089 = vmatmul.msk.f32.gmra.mxu0 %vm60_vm0, %v34_v42  ;;  %1097 = vmatmul.msk.f32.gmra.mxu1 %vm60_vm0, %v34_v42 }
 0x44f   :  { %1164 = vpow2.f32 %v1109_v43  ;;  %v35_v43 = vld [vmem:[%s1771_s0 + $0x28] sm:$0xff] }
 0x453   :  { %v1163_v37 = vpop.eup %1162 }
 0x454   :  { %473 = vrot.lane.b32.xlu0 %v1163_v37, %s1261_s27 }
 0x455   :  { %v1165_v44 = vpop.eup %1164 }
 0x456   :  { %v438_v45 = vadd.f32 1.0, %v1165_v44  ;;  %1090 = vmatmul.msk.f32.gmra.mxu0 %vm60_vm0, %v35_v43  ;;  %1098 = vmatmul.msk.f32.gmra.mxu1 %vm60_vm0, %v35_v43  ;;  %v36_v44 = vld [vmem:[%s1771_s0 + $0x30] sm:$0xff] }
 0x458   :  { %1166 = vrcp.f32 %v438_v45  ;;  %v451_v51 = vand.u32 2147483648, %v438_v45  ;;  %vm445_vm3 = vweird.f32 %v438_v45  ;;  %v449_v52 = vand.u32 2147483647, %v438_v45 }
 0x45a   :  { %v452_v54 = vor.u32 1.1754944e-38, %v451_v51  ;;  %vm450_vm5 = vcmp.eq.f32.partialorder %v449_v52, 8.507059e+37 }
 0x45e   :  { %v1167_v46 = vpop.eup %1166  ;;  %1091 = vmatmul.msk.f32.gmra.mxu0 %vm60_vm0, %v36_v44  ;;  %1099 = vmatmul.msk.f32.gmra.mxu1 %vm60_vm0, %v36_v44 }
 0x45f   :  { %v441_v47 = vmul.f32 %v1167_v46, %v438_v45  ;;  %vm446_vm2 = vweird.f32 %v1167_v46 }
 0x460   :  { %vm447_vm4 = vmor %vm445_vm3, %vm446_vm2 }
 0x461   :  { %v442_v48 = vsub.f32 1.0, %v441_v47  ;;  %v37_v47 = vld [vmem:[%s1771_s0 + $0x38] sm:$0xff] }
 0x463   :  { %v443_v49 = vmul.f32 %v1167_v46, %v442_v48 }
 0x465   :  { %v444_v50 = vadd.f32 %v1167_v46, %v443_v49 }
 0x466   :  { %1092 = vmatmul.msk.f32.gmra.mxu0 %vm60_vm0, %v37_v47  ;;  %1100 = vmatmul.msk.f32.gmra.mxu1 %vm60_vm0, %v37_v47 }
 0x467   :  { %v448_v53 = vsel %vm447_vm4, %v1167_v46, %v444_v50 }
 0x468   :  { %v453_v56 = vsel %vm450_vm5, %v452_v54, %v448_v53 }
 0x469   :  { %v471_v58 = vmul.f32 %v453_v56, %v1568_v61 }
 0x4c6   :  { %v474_v55 = vpop.permute.xlu0 %473 }
 0x4c7   :  { %v476_v57 = vmul.f32 %v474_v55, %v453_v56 }
 0x4c9   :  { %478 = vrot.lane.b32.xlu1 %v476_v57, %s1261_s27 }
 0x53b   :  { %v479_v59 = vpop.permute.xlu1 %478 }
 0x53c   :  { %v1604_v60 = vadd.f32 %v479_v59, %v471_v58 }
 0x53e   :  { %1168 = vtanh.f32 %v1604_v60 }
 0x53f   :  { %1170 = vpow2.f32 %v1110_v2 }
 0x544   :  { %v1169_v62 = vpop.eup %1168 }
 0x545   :  { %484 = vrot.lane.b32.xlu2 %v1169_v62, %s1261_s27  ;;  %v1171_v3 = vpop.eup %1170 }
 0x546   :  { %v439_v5 = vadd.f32 1.0, %v1171_v3 }
 0x548   :  { %1172 = vrcp.f32 %v439_v5  ;;  %v466_v16 = vand.u32 2147483648, %v439_v5  ;;  %vm460_vm7 = vweird.f32 %v439_v5  ;;  %v464_v18 = vand.u32 2147483647, %v439_v5 }
 0x54a   :  { %v467_v22 = vor.u32 1.1754944e-38, %v466_v16  ;;  %vm465_vm9 = vcmp.eq.f32.partialorder %v464_v18, 8.507059e+37 }
 0x54e   :  { %v1173_v61 = vpop.eup %1172 }
 0x54f   :  { %v456_v63 = vmul.f32 %v1173_v61, %v439_v5  ;;  %vm461_vm6 = vweird.f32 %v1173_v61 }
 0x550   :  { %vm462_vm8 = vmor %vm460_vm7, %vm461_vm6 }
 0x551   :  { %v457_v10 = vsub.f32 1.0, %v456_v63 }
 0x553   :  { %v458_v12 = vmul.f32 %v1173_v61, %v457_v10 }
 0x555   :  { %v459_v14 = vadd.f32 %v1173_v61, %v458_v12 }
 0x557   :  { %v463_v20 = vsel %vm462_vm8, %v1173_v61, %v459_v14 }
 0x558   :  { %v468_v24 = vsel %vm465_vm9, %v467_v22, %v463_v20 }
 0x59f   :  { %v485_v25 = vpop.permute.xlu2 %484 }
 0x5a0   :  { %v487_v30 = vmul.f32 %v485_v25, %v468_v24 }
 0x5a2   :  { %v1615_v33 = vadd.f32 %v487_v30, %v386_v27  ;;  %1111 = vmatmul.msk.f32.vlgmr.msrb.gmra.mxu2 %vm60_vm0, %v487_v30  ;;  %1112 = vmatmul.msk.f32.vlgmr.msrb.gmra.mxu3 %vm60_vm0, %v487_v30 }
 0x5a3   :  { %908 = vmatpush.msrb.mxu2 %v1351_v9  ;;  %928 = vmatpush.msrb.mxu3 %v1311_v0  ;;  %v152_v0 = vpop.f32.mrf.mxu1 }
 0x5a5   :  { %909 = vmatpush.msrb.mxu2 %v1360_v11  ;;  %929 = vmatpush.msrb.mxu3 %v1316_v1  ;;  %v153_v1 = vadd.f32 %v152_v0, %v1524_v35 }
 0x5a7   :  { %910 = vmatpush.msrb.mxu2 %v1369_v13  ;;  %930 = vmatpush.msrb.mxu3 %v1328_v4 }
 0x5a9   :  { %911 = vmatpush.msrb.mxu2 %v1387_v17  ;;  %931 = vmatpush.msrb.mxu3 %v1337_v6 }
 0x5ab   :  { %912 = vmatpush.msrb.mxu2 %v1404_v21  ;;  %932 = vmatpush.msrb.mxu3 %v1346_v8  ;;  %v111_v8 = vpop.f32.mrf.mxu0  ;;  %v155_v61 = vpop.f32.mrf.mxu1 }
 0x5ac   :  { %v112_v11 = vadd.f32 %v111_v8, %v1528_v41  ;;  %v156_v14 = vadd.f32 %v155_v61, %v1524_v35 }
 0x5ad   :  { %913 = vmatpush.msrb.mxu2 %v1427_v26  ;;  %933 = vmatpush.msrb.mxu3 %v1377_v15 }
 0x5af   :  { %914 = vmatpush.msrb.mxu2 %v1437_v29  ;;  %934 = vmatpush.msrb.mxu3 %v1395_v19 }
 0x5b1   :  { %915 = vmatpush.msrb.mxu2 %v1446_v31  ;;  %935 = vmatpush.msrb.mxu3 %v1413_v23 }
 0x5b3   :  { %v1669_v63 = vpop.f32.mrf.mxu1  ;;  %v114_v22 = vpop.f32.mrf.mxu0 }
 0x5b4   :  { %v115_v30 = vadd.f32 %v114_v22, %v1528_v41 }
 0x5bb   :  { %v1671_v10 = vpop.f32.mrf.mxu1  ;;  %v1677_v24 = vpop.f32.mrf.mxu0 }
 0x5c3   :  { %v1673_v12 = vpop.f32.mrf.mxu1  ;;  %v1679_v25 = vpop.f32.mrf.mxu0 }
 0x5cb   :  { %v1681_v27 = vpop.f32.mrf.mxu0 }
 0x625   :  { %v529_v4 = vpop.f32.mrf.mxu3  ;;  %v509_v13 = vpop.f32.mrf.mxu2 }
 0x626   :  { %v533_v6 = vadd.f32 %v529_v4, %v153_v1  ;;  %v532_v15 = vadd.f32 %v509_v13, %v112_v11 }
 0x628   :  { %1174 = vtanh.f32 %v533_v6  ;;  %v1113_v17 = vmul.f32 -1.442695, %v532_v15  ;;  %v1114_v50 = vmul.f32 -1.442695, %v533_v6 }
 0x62a   :  { %1176 = vpow2.f32 %v1113_v17 }
 0x62e   :  { %v1175_v9 = vpop.eup %1174 }
 0x62f   :  { %575 = vrot.lane.b32.xlu0 %v1175_v9, %s1261_s27 }
 0x630   :  { %v1177_v19 = vpop.eup %1176 }
 0x631   :  { %v540_v21 = vadd.f32 1.0, %v1177_v19 }
 0x633   :  { %1178 = vrcp.f32 %v540_v21  ;;  %v553_v28 = vand.u32 2147483648, %v540_v21  ;;  %vm547_vm11 = vweird.f32 %v540_v21  ;;  %v551_v34 = vand.u32 2147483647, %v540_v21 }
 0x635   :  { %v554_v37 = vor.u32 1.1754944e-38, %v553_v28  ;;  %vm552_vm13 = vcmp.eq.f32.partialorder %v551_v34, 8.507059e+37 }
 0x639   :  { %v1179_v23 = vpop.eup %1178 }
 0x63a   :  { %v543_v26 = vmul.f32 %v1179_v23, %v540_v21  ;;  %vm548_vm10 = vweird.f32 %v1179_v23 }
 0x63b   :  { %vm549_vm12 = vmor %vm547_vm11, %vm548_vm10 }
 0x63c   :  { %v544_v29 = vsub.f32 1.0, %v543_v26 }
 0x63e   :  { %v545_v31 = vmul.f32 %v1179_v23, %v544_v29 }
 0x640   :  { %v546_v32 = vadd.f32 %v1179_v23, %v545_v31 }
 0x642   :  { %v550_v36 = vsel %vm549_vm12, %v1179_v23, %v546_v32 }
 0x643   :  { %v555_v39 = vsel %vm552_vm13, %v554_v37, %v550_v36 }
 0x644   :  { %v573_v45 = vmul.f32 %v555_v39, %v1604_v60 }
 0x6a1   :  { %v576_v38 = vpop.permute.xlu0 %575 }
 0x6a2   :  { %v578_v40 = vmul.f32 %v576_v38, %v555_v39 }
 0x6a4   :  { %580 = vrot.lane.b32.xlu1 %v578_v40, %s1261_s27 }
 0x716   :  { %v581_v46 = vpop.permute.xlu1 %580 }
 0x717   :  { %v1658_v48 = vadd.f32 %v581_v46, %v573_v45 }
 0x719   :  { %1180 = vtanh.f32 %v1658_v48 }
 0x71a   :  { %1182 = vpow2.f32 %v1114_v50 }
 0x71f   :  { %v1181_v49 = vpop.eup %1180 }
 0x720   :  { %586 = vrot.lane.b32.xlu2 %v1181_v49, %s1261_s27  ;;  %v1183_v51 = vpop.eup %1182 }
 0x721   :  { %v541_v52 = vadd.f32 1.0, %v1183_v51 }
 0x723   :  { %1184 = vrcp.f32 %v541_v52  ;;  %v568_v58 = vand.u32 2147483648, %v541_v52  ;;  %vm562_vm15 = vweird.f32 %v541_v52  ;;  %v566_v59 = vand.u32 2147483647, %v541_v52 }
 0x725   :  { %v569_v62 = vor.u32 1.1754944e-38, %v568_v58  ;;  %vm567_vm2 = vcmp.eq.f32.partialorder %v566_v59, 8.507059e+37  ;;  %v118_v59 = vadd.f32 %v1677_v24, %v1528_v41 }
 0x729   :  { %v1185_v53 = vpop.eup %1184 }
 0x72a   :  { %v558_v54 = vmul.f32 %v1185_v53, %v541_v52  ;;  %vm563_vm14 = vweird.f32 %v1185_v53 }
 0x72b   :  { %vm564_vm1 = vmor %vm562_vm15, %vm563_vm14 }
 0x72c   :  { %v559_v55 = vsub.f32 1.0, %v558_v54  ;;  %v159_v54 = vadd.f32 %v1669_v63, %v1524_v35 }
 0x72e   :  { %v560_v56 = vmul.f32 %v1185_v53, %v559_v55 }
 0x730   :  { %v561_v57 = vadd.f32 %v1185_v53, %v560_v56 }
 0x732   :  { %v565_v60 = vsel %vm564_vm1, %v1185_v53, %v561_v57 }
 0x733   :  { %v570_v2 = vsel %vm567_vm2, %v569_v62, %v565_v60 }
 0x77a   :  { %v587_v3 = vpop.permute.xlu2 %586 }
 0x77b   :  { %v589_v5 = vmul.f32 %v587_v3, %v570_v2 }
 0x77d   :  { %v1665_v7 = vadd.f32 %v589_v5, %v1615_v33  ;;  %1115 = vmatmul.msk.f32.vlgmr.msrb.gmra.mxu0 %vm60_vm0, %v589_v5  ;;  %1116 = vmatmul.msk.f32.vlgmr.msrb.gmra.mxu1 %vm60_vm0, %v589_v5 }
 0x7fa   :  { %v631_v16 = vpop.f32.mrf.mxu1  ;;  %v611_v33 = vpop.f32.mrf.mxu0 }
 0x7fb   :  { %v635_v18 = vadd.f32 %v631_v16, %v156_v14  ;;  %v634_v0 = vadd.f32 %v611_v33, %v115_v30 }
 0x7fd   :  { %1186 = vtanh.f32 %v635_v18  ;;  %v1117_v1 = vmul.f32 -1.442695, %v634_v0  ;;  %v1118_v37 = vmul.f32 -1.442695, %v635_v18 }
 0x7ff   :  { %1188 = vpow2.f32 %v1117_v1 }
 0x803   :  { %v1187_v20 = vpop.eup %1186 }
 0x804   :  { %677 = vrot.lane.b32.xlu0 %v1187_v20, %s1261_s27 }
 0x805   :  { %v1189_v4 = vpop.eup %1188 }
 0x806   :  { %v642_v6 = vadd.f32 1.0, %v1189_v4 }
 0x808   :  { %1190 = vrcp.f32 %v642_v6  ;;  %v655_v17 = vand.u32 2147483648, %v642_v6  ;;  %vm649_vm4 = vweird.f32 %v642_v6  ;;  %v653_v19 = vand.u32 2147483647, %v642_v6 }
 0x80a   :  { %v656_v23 = vor.u32 1.1754944e-38, %v655_v17  ;;  %vm654_vm6 = vcmp.eq.f32.partialorder %v653_v19, 8.507059e+37 }
 0x80e   :  { %v1191_v9 = vpop.eup %1190 }
 0x80f   :  { %v645_v8 = vmul.f32 %v1191_v9, %v642_v6  ;;  %vm650_vm3 = vweird.f32 %v1191_v9 }
 0x810   :  { %vm651_vm5 = vmor %vm649_vm4, %vm650_vm3 }
 0x811   :  { %v646_v11 = vsub.f32 1.0, %v645_v8 }
 0x813   :  { %v647_v13 = vmul.f32 %v1191_v9, %v646_v11 }
 0x815   :  { %v648_v15 = vadd.f32 %v1191_v9, %v647_v13 }
 0x817   :  { %v652_v21 = vsel %vm651_vm5, %v1191_v9, %v648_v15 }
 0x818   :  { %v657_v29 = vsel %vm654_vm6, %v656_v23, %v652_v21 }
 0x819   :  { %v675_v32 = vmul.f32 %v657_v29, %v1658_v48 }
 0x876   :  { %v678_v26 = vpop.permute.xlu0 %677 }
 0x877   :  { %v680_v31 = vmul.f32 %v678_v26, %v657_v29 }
 0x879   :  { %682 = vrot.lane.b32.xlu1 %v680_v31, %s1261_s27 }
 0x8eb   :  { %v683_v28 = vpop.permute.xlu1 %682 }
 0x8ec   :  { %v685_v34 = vadd.f32 %v683_v28, %v675_v32 }
 0x8ee   :  { %1192 = vtanh.f32 %v685_v34 }
 0x8ef   :  { %1194 = vpow2.f32 %v1118_v37  ;;  %v162_v37 = vadd.f32 %v1671_v10, %v1524_v35 }
 0x8f4   :  { %v1193_v36 = vpop.eup %1192 }
 0x8f5   :  { %688 = vrot.lane.b32.xlu2 %v1193_v36, %s1261_s27  ;;  %v1195_v38 = vpop.eup %1194 }
 0x8f6   :  { %v643_v39 = vadd.f32 1.0, %v1195_v38 }
 0x8f8   :  { %1196 = vrcp.f32 %v643_v39  ;;  %v670_v46 = vand.u32 2147483648, %v643_v39  ;;  %vm664_vm8 = vweird.f32 %v643_v39  ;;  %v668_v47 = vand.u32 2147483647, %v643_v39 }
 0x8fa   :  { %v671_v49 = vor.u32 1.1754944e-38, %v670_v46  ;;  %vm669_vm10 = vcmp.eq.f32.partialorder %v668_v47, 8.507059e+37 }
 0x8fe   :  { %v1197_v40 = vpop.eup %1196 }
 0x8ff   :  { %v660_v42 = vmul.f32 %v1197_v40, %v643_v39  ;;  %vm665_vm7 = vweird.f32 %v1197_v40 }
 0x900   :  { %vm666_vm9 = vmor %vm664_vm8, %vm665_vm7 }
 0x901   :  { %v661_v43 = vsub.f32 1.0, %v660_v42 }
 0x903   :  { %v662_v44 = vmul.f32 %v1197_v40, %v661_v43  ;;  %v121_v43 = vadd.f32 %v1679_v25, %v1528_v41 }
 0x905   :  { %v663_v45 = vadd.f32 %v1197_v40, %v662_v44 }
 0x907   :  { %v667_v48 = vsel %vm666_vm9, %v1197_v40, %v663_v45 }
 0x908   :  { %v672_v50 = vsel %vm669_vm10, %v671_v49, %v667_v48 }
 0x94f   :  { %v689_v51 = vpop.permute.xlu2 %688 }
 0x950   :  { %v691_v52 = vmul.f32 %v689_v51, %v672_v50 }
 0x952   :  { %v692_v53 = vadd.f32 %v691_v52, %v1665_v7  ;;  %1119 = vmatmul.msk.f32.vlgmr.msra.gmra.mxu2 %vm60_vm0, %v691_v52  ;;  %1120 = vmatmul.msk.f32.vlgmr.msra.gmra.mxu3 %vm60_vm0, %v691_v52 }
 0x9d5   :  { %v733_v55 = vpop.f32.mrf.mxu3  ;;  %v713_v58 = vpop.f32.mrf.mxu2 }
 0x9d6   :  { %v737_v56 = vadd.f32 %v733_v55, %v159_v54  ;;  %v736_v60 = vadd.f32 %v713_v58, %v118_v59 }
 0x9d8   :  { %1198 = vtanh.f32 %v737_v56  ;;  %v1121_v62 = vmul.f32 -1.442695, %v736_v60  ;;  %v1122_v9 = vmul.f32 -1.442695, %v737_v56 }
 0x9da   :  { %1200 = vpow2.f32 %v1121_v62 }
 0x9de   :  { %v1199_v57 = vpop.eup %1198 }
 0x9df   :  { %779 = vrot.lane.b32.xlu0 %v1199_v57, %s1261_s27 }
 0x9e0   :  { %v1201_v2 = vpop.eup %1200 }
 0x9e1   :  { %v744_v3 = vadd.f32 1.0, %v1201_v2 }
 0x9e3   :  { %1202 = vrcp.f32 %v744_v3  ;;  %v757_v16 = vand.u32 2147483648, %v744_v3  ;;  %vm751_vm12 = vweird.f32 %v744_v3  ;;  %v755_v18 = vand.u32 2147483647, %v744_v3 }
 0x9e5   :  { %v758_v22 = vor.u32 1.1754944e-38, %v757_v16  ;;  %vm756_vm14 = vcmp.eq.f32.partialorder %v755_v18, 8.507059e+37 }
 0x9e9   :  { %v1203_v5 = vpop.eup %1202 }
 0x9ea   :  { %v747_v7 = vmul.f32 %v1203_v5, %v744_v3  ;;  %vm752_vm11 = vweird.f32 %v1203_v5 }
 0x9eb   :  { %vm753_vm13 = vmor %vm751_vm12, %vm752_vm11 }
 0x9ec   :  { %v748_v61 = vsub.f32 1.0, %v747_v7 }
 0x9ee   :  { %v749_v63 = vmul.f32 %v1203_v5, %v748_v61 }
 0x9f0   :  { %v750_v14 = vadd.f32 %v1203_v5, %v749_v63 }
 0x9f2   :  { %v754_v20 = vsel %vm753_vm13, %v1203_v5, %v750_v14 }
 0x9f3   :  { %v759_v30 = vsel %vm756_vm14, %v758_v22, %v754_v20 }
 0x9f4   :  { %v777_v0 = vmul.f32 %v759_v30, %v685_v34 }
 0xa51   :  { %v780_v24 = vpop.permute.xlu0 %779 }
 0xa52   :  { %v782_v33 = vmul.f32 %v780_v24, %v759_v30 }
 0xa54   :  { %784 = vrot.lane.b32.xlu1 %v782_v33, %s1261_s27 }
 0xac6   :  { %v785_v1 = vpop.permute.xlu1 %784 }
 0xac7   :  { %v787_v4 = vadd.f32 %v785_v1, %v777_v0 }
 0xac9   :  { %1204 = vtanh.f32 %v787_v4 }
 0xaca   :  { %1206 = vpow2.f32 %v1122_v9 }
 0xacf   :  { %v1205_v6 = vpop.eup %1204 }
 0xad0   :  { %790 = vrot.lane.b32.xlu2 %v1205_v6, %s1261_s27  ;;  %v1207_v8 = vpop.eup %1206 }
 0xad1   :  { %v745_v11 = vadd.f32 1.0, %v1207_v8 }
 0xad3   :  { %1208 = vrcp.f32 %v745_v11  ;;  %v772_v23 = vand.u32 2147483648, %v745_v11  ;;  %vm766_vm1 = vweird.f32 %v745_v11  ;;  %v770_v26 = vand.u32 2147483647, %v745_v11 }
 0xad5   :  { %v773_v31 = vor.u32 1.1754944e-38, %v772_v23  ;;  %vm771_vm3 = vcmp.eq.f32.partialorder %v770_v26, 8.507059e+37 }
 0xad9   :  { %v1209_v13 = vpop.eup %1208 }
 0xada   :  { %v762_v15 = vmul.f32 %v1209_v13, %v745_v11  ;;  %vm767_vm15 = vweird.f32 %v1209_v13 }
 0xadb   :  { %vm768_vm2 = vmor %vm766_vm1, %vm767_vm15 }
 0xadc   :  { %v763_v17 = vsub.f32 1.0, %v762_v15 }
 0xade   :  { %v764_v19 = vmul.f32 %v1209_v13, %v763_v17 }
 0xae0   :  { %v765_v21 = vadd.f32 %v1209_v13, %v764_v19 }
 0xae2   :  { %v769_v29 = vsel %vm768_vm2, %v1209_v13, %v765_v21  ;;  %v124_v13 = vadd.f32 %v1681_v27, %v1528_v41 }
 0xae3   :  { %v774_v32 = vsel %vm771_vm3, %v773_v31, %v769_v29 }
 0xb2a   :  { %v791_v28 = vpop.permute.xlu2 %790 }
 0xb2b   :  { %v793_v34 = vmul.f32 %v791_v28, %v774_v32 }
 0xb2d   :  { %v1697_v36 = vadd.f32 %v793_v34, %v692_v53  ;;  %1123 = vmatmul.msk.f32.vlgmr.msra.gmra.mxu0 %vm60_vm0, %v793_v34  ;;  %1124 = vmatmul.msk.f32.vlgmr.msra.gmra.mxu1 %vm60_vm0, %v793_v34 }
 0xbaa   :  { %v835_v38 = vpop.f32.mrf.mxu1  ;;  %v815_v42 = vpop.f32.mrf.mxu0 }
 0xbab   :  { %v839_v39 = vadd.f32 %v835_v38, %v162_v37  ;;  %v838_v44 = vadd.f32 %v815_v42, %v121_v43  ;;  %v1007_v37 = vld [vmem:[%s1775_s4 + $0x38] sm:$0xff]  ;;  %v1006_v38 = vld [vmem:[%s1775_s4 + $0x30] sm:$0xff] }
 0xbac   :  { %1023 = vmatpush.msrb.mxu0 %v1007_v37  ;;  %v1003_v42 = vld [vmem:[%s1775_s4 + $0x18] sm:$0xff] }
 0xbad   :  { %1210 = vtanh.f32 %v839_v39  ;;  %v1125_v45 = vmul.f32 -1.442695, %v838_v44  ;;  %v1126_v2 = vmul.f32 -1.442695, %v839_v39  ;;  %v1005_v39 = vld [vmem:[%s1775_s4 + $0x28] sm:$0xff] }
 0xbae   :  { %1024 = vmatpush.msrb.mxu0 %v1006_v38 }
 0xbaf   :  { %1212 = vpow2.f32 %v1125_v45 }
 0xbb0   :  { %1025 = vmatpush.msrb.mxu0 %v1005_v39 }
 0xbb3   :  { %v1211_v40 = vpop.eup %1210 }
 0xbb4   :  { %881 = vrot.lane.b32.xlu0 %v1211_v40, %s1261_s27  ;;  %v1004_v40 = vld [vmem:[%s1775_s4 + $0x20] sm:$0xff] }
 0xbb5   :  { %v1213_v46 = vpop.eup %1212  ;;  %1026 = vmatpush.msrb.mxu0 %v1004_v40 }
 0xbb6   :  { %v846_v47 = vadd.f32 1.0, %v1213_v46 }
 0xbb7   :  { %1027 = vmatpush.msrb.mxu0 %v1003_v42 }
 0xbb8   :  { %1214 = vrcp.f32 %v846_v47  ;;  %v859_v52 = vand.u32 2147483648, %v846_v47  ;;  %vm853_vm5 = vweird.f32 %v846_v47  ;;  %v857_v53 = vand.u32 2147483647, %v846_v47 }
 0xbba   :  { %v860_v55 = vor.u32 1.1754944e-38, %v859_v52  ;;  %vm858_vm7 = vcmp.eq.f32.partialorder %v857_v53, 8.507059e+37  ;;  %v1039_v52 = vld [vmem:[%s1777_s6 + $0x18] sm:$0xff]  ;;  %v1038_v53 = vld [vmem:[%s1777_s6 + $0x10] sm:$0xff] }
 0xbbb   :  { %1060 = vmatpush.msrb.mxu1 %v1039_v52 }
 0xbbd   :  { %1061 = vmatpush.msrb.mxu1 %v1038_v53 }
 0xbbe   :  { %v1215_v48 = vpop.eup %1214 }
 0xbbf   :  { %v849_v49 = vmul.f32 %v1215_v48, %v846_v47  ;;  %vm854_vm4 = vweird.f32 %v1215_v48 }
 0xbc0   :  { %vm855_vm6 = vmor %vm853_vm5, %vm854_vm4  ;;  %vm1044_vm5 = vcmask 261120  }
 0xbc1   :  { %v850_v50 = vsub.f32 1.0, %v849_v49 }
 0xbc3   :  { %v851_v10 = vmul.f32 %v1215_v48, %v850_v50  ;;  %v1002_v50 = vld [vmem:[%s1775_s4 + $0x10] sm:$0xff] }
 0xbc4   :  { %1028 = vmatpush.msrb.mxu0 %v1002_v50 }
 0xbc5   :  { %v852_v51 = vadd.f32 %v1215_v48, %v851_v10  ;;  %v1001_v10 = vld [vmem:[%s1775_s4 + $0x8] sm:$0xff] }
 0xbc6   :  { %1029 = vmatpush.msrb.mxu0 %v1001_v10 }
 0xbc7   :  { %v856_v54 = vsel %vm855_vm6, %v1215_v48, %v852_v51  ;;  %v1000_v51 = vld [vmem:[%s1775_s4] sm:$0xff] }
 0xbc8   :  { %v861_v56 = vsel %vm858_vm7, %v860_v55, %v856_v54  ;;  %1030 = vmatpush.msrb.mxu0 %v1000_v51 }
 0xbc9   :  { %v879_v58 = vmul.f32 %v861_v56, %v787_v4  ;;  %v165_v4 = vadd.f32 %v1673_v12, %v1524_v35 }
 0xc26   :  { %v882_v25 = vpop.permute.xlu0 %881 }
 0xc27   :  { %v884_v57 = vmul.f32 %v882_v25, %v861_v56 }
 0xc29   :  { %886 = vrot.lane.b32.xlu1 %v884_v57, %s1261_s27 }
 0xc9b   :  { %v887_v59 = vpop.permute.xlu1 %886 }
 0xc9c   :  { %v1707_v60 = vadd.f32 %v887_v59, %v879_v58 }
 0xc9e   :  { %1216 = vtanh.f32 %v1707_v60 }
 0xc9f   :  { %1218 = vpow2.f32 %v1126_v2 }
 0xca4   :  { %v1217_v62 = vpop.eup %1216 }
 0xca5   :  { %892 = vrot.lane.b32.xlu2 %v1217_v62, %s1261_s27  ;;  %v1219_v3 = vpop.eup %1218 }
 0xca6   :  { %v847_v5 = vadd.f32 1.0, %v1219_v3 }
 0xca8   :  { %1220 = vrcp.f32 %v847_v5  ;;  %v874_v18 = vand.u32 2147483648, %v847_v5  ;;  %vm868_vm9 = vweird.f32 %v847_v5  ;;  %v872_v20 = vand.u32 2147483647, %v847_v5 }
 0xcaa   :  { %v875_v24 = vor.u32 1.1754944e-38, %v874_v18  ;;  %vm873_vm11 = vcmp.eq.f32.partialorder %v872_v20, 8.507059e+37 }
 0xcae   :  { %v1221_v7 = vpop.eup %1220 }
 0xcaf   :  { %v864_v61 = vmul.f32 %v1221_v7, %v847_v5  ;;  %vm869_vm8 = vweird.f32 %v1221_v7 }
 0xcb0   :  { %vm870_vm10 = vmor %vm868_vm9, %vm869_vm8 }
 0xcb1   :  { %v865_v63 = vsub.f32 1.0, %v864_v61 }
 0xcb3   :  { %v866_v14 = vmul.f32 %v1221_v7, %v865_v63  ;;  %v1037_v63 = vld [vmem:[%s1777_s6 + $0x8] sm:$0xff] }
 0xcb4   :  { %1062 = vmatpush.msrb.mxu1 %v1037_v63 }
 0xcb5   :  { %v867_v16 = vadd.f32 %v1221_v7, %v866_v14  ;;  %v1036_v14 = vld [vmem:[%s1777_s6] sm:$0xff]  ;;  %s1076_s6 = sshll.u32 %s1779_s8, 4  ;;  %s1077_s6 = int_to_ptr.hbm [resolvable:$true] %s1076_s6 }
 0xcb6   :  { %1063 = vmatpush.msrb.mxu1 %v1036_v14 }
 0xcb7   :  { %v871_v22 = vsel %vm870_vm10, %v1221_v7, %v867_v16  ;;  %v1136_v16 = vld [vmem:[%s1776_s5] ss:$0 sm:$0xff] }
 0xcb8   :  { %v876_v30 = vsel %vm873_vm11, %v875_v24, %v871_v22  ;;  %v1137_v24 = vld [vmem:[%s1778_s7] ss:$0 sm:$0xff] }
 0xcff   :  { %v893_v33 = vpop.permute.xlu2 %892 }
 0xd00   :  { %v895_v0 = vmul.f32 %v893_v33, %v876_v30 }
 0xd02   :  { %1127 = vmatmul.msk.f32.vlgmr.msrb.gmra.mxu2 %vm60_vm0, %v895_v0  ;;  %1128 = vmatmul.msk.f32.vlgmr.msrb.gmra.mxu3 %vm60_vm0, %v895_v0  ;;  %v1714_v1 = vadd.f32 %v895_v0, %v1697_v36 }
 0xd85   :  { %v937_v6 = vpop.f32.mrf.mxu3  ;;  %v917_v11 = vpop.f32.mrf.mxu2 }
 0xd86   :  { %v941_v9 = vadd.f32 %v937_v6, %v165_v4  ;;  %v940_v15 = vadd.f32 %v917_v11, %v124_v13 }
 0xd88   :  { %1222 = vtanh.f32 %v941_v9  ;;  %v1129_v17 = vmul.f32 -1.442695, %v940_v15  ;;  %v1130_v47 = vmul.f32 -1.442695, %v941_v9 }
 0xd8a   :  { %1224 = vpow2.f32 %v1129_v17 }
 0xd8e   :  { %v1223_v8 = vpop.eup %1222 }
 0xd8f   :  { %983 = vrot.lane.b32.xlu0 %v1223_v8, %s1261_s27 }
 0xd90   :  { %v1225_v19 = vpop.eup %1224 }
 0xd91   :  { %v948_v21 = vadd.f32 1.0, %v1225_v19 }
 0xd93   :  { %1226 = vrcp.f32 %v948_v21  ;;  %v961_v31 = vand.u32 2147483648, %v948_v21  ;;  %vm955_vm13 = vweird.f32 %v948_v21  ;;  %v959_v32 = vand.u32 2147483647, %v948_v21 }
 0xd95   :  { %v962_v34 = vor.u32 1.1754944e-38, %v961_v31  ;;  %vm960_vm15 = vcmp.eq.f32.partialorder %v959_v32, 8.507059e+37 }
 0xd99   :  { %v1227_v23 = vpop.eup %1226 }
 0xd9a   :  { %v951_v26 = vmul.f32 %v1227_v23, %v948_v21  ;;  %vm956_vm12 = vweird.f32 %v1227_v23 }
 0xd9b   :  { %vm957_vm14 = vmor %vm955_vm13, %vm956_vm12 }
 0xd9c   :  { %v952_v29 = vsub.f32 1.0, %v951_v26 }
 0xd9e   :  { %v953_v35 = vmul.f32 %v1227_v23, %v952_v29 }
 0xda0   :  { %v954_v12 = vadd.f32 %v1227_v23, %v953_v35 }
 0xda2   :  { %v958_v28 = vsel %vm957_vm14, %v1227_v23, %v954_v12 }
 0xda3   :  { %v963_v27 = vsel %vm960_vm15, %v962_v34, %v958_v28 }
 0xda4   :  { %v981_v43 = vmul.f32 %v963_v27, %v1707_v60 }
 0xe01   :  { %v984_v41 = vpop.permute.xlu0 %983 }
 0xe02   :  { %v986_v36 = vmul.f32 %v984_v41, %v963_v27 }
 0xe04   :  { %988 = vrot.lane.b32.xlu1 %v986_v36, %s1261_s27 }
 0xe76   :  { %v989_v44 = vpop.permute.xlu1 %988 }
 0xe77   :  { %v991_v45 = vadd.f32 %v989_v44, %v981_v43 }
 0xe79   :  { %1228 = vtanh.f32 %v991_v45 }
 0xe7a   :  { %1230 = vpow2.f32 %v1130_v47 }
 0xe7f   :  { %v1229_v46 = vpop.eup %1228 }
 0xe80   :  { %994 = vrot.lane.b32.xlu2 %v1229_v46, %s1261_s27  ;;  %v1231_v48 = vpop.eup %1230 }
 0xe81   :  { %v949_v49 = vadd.f32 1.0, %v1231_v48 }
 0xe83   :  { %1232 = vrcp.f32 %v949_v49  ;;  %v976_v58 = vand.u32 2147483648, %v949_v49  ;;  %vm970_vm2 = vweird.f32 %v949_v49  ;;  %v974_v59 = vand.u32 2147483647, %v949_v49 }
 0xe85   :  { %v977_v62 = vor.u32 1.1754944e-38, %v976_v58  ;;  %vm975_vm4 = vcmp.eq.f32.partialorder %v974_v59, 8.507059e+37 }
 0xe89   :  { %v1233_v54 = vpop.eup %1232 }
 0xe8a   :  { %v966_v55 = vmul.f32 %v1233_v54, %v949_v49  ;;  %vm971_vm1 = vweird.f32 %v1233_v54 }
 0xe8b   :  { %vm972_vm3 = vmor %vm970_vm2, %vm971_vm1 }
 0xe8c   :  { %v967_v25 = vsub.f32 1.0, %v966_v55 }
 0xe8e   :  { %v968_v56 = vmul.f32 %v1233_v54, %v967_v25 }
 0xe90   :  { %v969_v57 = vadd.f32 %v1233_v54, %v968_v56 }
 0xe92   :  { %v973_v60 = vsel %vm972_vm3, %v1233_v54, %v969_v57 }
 0xe93   :  { %v978_v2 = vsel %vm975_vm4, %v977_v62, %v973_v60 }
 0xeda   :  { %v995_v3 = vpop.permute.xlu2 %994 }
 0xedb   :  { %v997_v5 = vmul.f32 %v995_v3, %v978_v2 }
 0xedd   :  { %v998_v7 = vadd.f32 %v997_v5, %v1714_v1 }
 0xedf   :  { %v999_v61 = vmul.f32 0.125, %v998_v7 }
 0xee1   :  { %1131 = vmatmul.msk.f32.vlgmr.msrb.gmra.mxu0 %vm60_vm0, %v999_v61 }
 0xf5e   :  { %v1032_v18 = vpop.f32.mrf.mxu0 }
 0xf5f   :  { %v1033_v20 = vadd.f32 %v1136_v16, %v1032_v18 }
 0xf61   :  { %v1035_v22 = vmax.f32 %v1033_v20, 0.0 }
 0xf63   :  { %1132 = vmatmul.msk.f32.vlgmr.msrb.gmra.mxu1 %vm1044_vm5, %v1035_v22 }
 0xfe0   :  { %v1065_v30 = vpop.f32.mrf.mxu1 }
 0xfe1   :  { %v1066_v33 = vadd.f32 %v1137_v24, %v1065_v30 }
 0xfe3   :  { %1068 = vst.msk [vmem:[#allocation2] sm:$0xff] %vm1044_vm5, %v1066_v33 }
 0xfe4   :  { %1079 = dma.vmem_to_hbm [thread:$0]  %s1075_s20, 128, %s1077_s6, [#allocation3]  }
 0xfe5   :  { %1258 = dma.done.wait [#allocation3], 128  }
 0xfe6   :  { %1259 = vsyncadd [#allocation3], 4294967168 }
 0xfe7   :  { %1084 = vsyncpa [#allocation3], 1 }

</bundles_post_ra>
